<compile_context>
chip_gen: v7x
topology: tpu7x:2x2x1
jax: 0.10.0
libtpu: 0.0.40
codegen_flags: <defaults>
</compile_context>

<pallas_src>
import jax
import jax.numpy as jnp
from jax import lax
from jax.experimental import pallas as pl
from jax.experimental.pallas import tpu as pltpu


# ----------------------------------------------------------------------------
# Pallas kernel 1: fused bidirectional LSTM layer, single invocation.
#   x_ref:   (T, B, D)      time-major input
#   w_ref:   (D+H, 8H)      [[W_ih_f, W_ih_b], [W_hh_f, W_hh_b]]
#   b_ref:   (1, 8H)        [b_f | b_b]   (each b = b_ih + b_hh)
#   out_ref: (T, B, 2H)     [:, :, :H] forward, [:, :, H:] backward
#   h_sc, c_sc: (2B, H)     rows [0:B] forward state, rows [B:2B] backward
# ----------------------------------------------------------------------------
def bilstm_kernel(x_ref, w_ref, b_ref, out_ref, h_sc, c_sc):
    T, B, _ = x_ref.shape
    H = h_sc.shape[-1]

    h_sc[...] = jnp.zeros_like(h_sc)
    c_sc[...] = jnp.zeros_like(c_sc)

    def body(t, carry):
        tb = T - 1 - t
        x_f = x_ref[t]                                   # (B, D)  forward input
        x_b = x_ref[tb]                                  # (B, D)  backward input
        x2 = jnp.concatenate([x_f, x_b], axis=0)         # (2B, D)
        lhs = jnp.concatenate([x2, h_sc[...]], axis=-1)  # (2B, D+H)

        # One MXU push for both directions; fwd rows use cols [0,4H),
        # bwd rows use cols [4H,8H); the off-diagonal halves are discarded.
        gates = jnp.dot(lhs, w_ref[...],
                        preferred_element_type=jnp.float32) + b_ref[...]  # (2B, 8H)
        g = jnp.concatenate([gates[:B, :4 * H], gates[B:, 4 * H:]], axis=0)  # (2B, 4H)

        # torch gate order: i, f, g, o
        i_g = jax.nn.sigmoid(g[:, 0 * H:1 * H])
        f_g = jax.nn.sigmoid(g[:, 1 * H:2 * H])
        g_g = jnp.tanh(g[:, 2 * H:3 * H])
        o_g = jax.nn.sigmoid(g[:, 3 * H:4 * H])

        c_new = f_g * c_sc[...] + i_g * g_g
        h_new = o_g * jnp.tanh(c_new)
        h_sc[...] = h_new
        c_sc[...] = c_new

        out_ref[t, :, :H] = h_new[:B]    # forward hidden at time t
        out_ref[tb, :, H:] = h_new[B:]   # backward hidden at time T-1-t
        return carry

    lax.fori_loop(0, T, body, 0, unroll=True)


def bilstm_layer(x, w_big, b_big):
    """x: (T, B, D), w_big: (D+H, 8H), b_big: (1, 8H) -> (T, B, 2H)."""
    T, B, _ = x.shape
    H = w_big.shape[1] // 8
    return pl.pallas_call(
        bilstm_kernel,
        out_shape=jax.ShapeDtypeStruct((T, B, 2 * H), jnp.float32),
        in_specs=[pl.BlockSpec(memory_space=pltpu.MemorySpace.VMEM)] * 3,
        out_specs=pl.BlockSpec(memory_space=pltpu.MemorySpace.VMEM),
        scratch_shapes=[pltpu.VMEM((2 * B, H), jnp.float32),
                        pltpu.VMEM((2 * B, H), jnp.float32)],
    )(x, w_big, b_big)


def fuse_bilstm_params(params_fwd, params_bwd):
    """Build the fused (D+H, 8H) weight / (1, 8H) bias for one biLSTM layer."""
    w_ih_f, w_hh_f, b_f = params_fwd
    w_ih_b, w_hh_b, b_b = params_bwd
    w_f = jnp.concatenate([w_ih_f, w_hh_f], axis=0)      # (D+H, 4H)
    w_b = jnp.concatenate([w_ih_b, w_hh_b], axis=0)      # (D+H, 4H)
    w_big = jnp.concatenate([w_f, w_b], axis=1)          # (D+H, 8H)
    b_big = jnp.concatenate([b_f, b_b], axis=1)          # (1, 8H)
    return w_big, b_big


# ----------------------------------------------------------------------------
# Pallas kernel 2: classifier matmul + mean cross-entropy over all tokens.
# Labels come in as int32; correct logit selected via iota compare (no one-hot
# HBM array).  Single invocation, everything VMEM-resident.
# ----------------------------------------------------------------------------
def clf_ce_kernel(h_ref, w_ref, b_ref, y_ref, loss_ref):
    logits = (jnp.dot(h_ref[...], w_ref[...], preferred_element_type=jnp.float32)
              + b_ref[...])                                   # (N, C)
    N, C = logits.shape
    m = jnp.max(logits, axis=-1, keepdims=True)
    lse = jnp.log(jnp.sum(jnp.exp(logits - m), axis=-1, keepdims=True)) + m
    col = lax.broadcasted_iota(jnp.int32, (N, C), 1)
    correct = jnp.sum(jnp.where(col == y_ref[...], logits, 0.0),
                      axis=-1, keepdims=True)
    loss_ref[...] = jnp.mean(lse - correct).reshape(1, 1)


def classifier_ce(h_packed, w_clf, b_clf, y_packed):
    loss = pl.pallas_call(
        clf_ce_kernel,
        out_shape=jax.ShapeDtypeStruct((1, 1), jnp.float32),
        in_specs=[pl.BlockSpec(memory_space=pltpu.MemorySpace.VMEM)] * 4,
        out_specs=pl.BlockSpec(memory_space=pltpu.MemorySpace.VMEM),
    )(h_packed, w_clf, b_clf, y_packed)
    return loss[0, 0]


# ----------------------------------------------------------------------------
# Full forward (training branch of NerLSTM.forward: returns the CE loss).
# ----------------------------------------------------------------------------
def ner_lstm_forward(tokens, labels, params):
    """tokens, labels: (B, T) int32.  Returns scalar loss."""
    B, T = tokens.shape
    # Embedding gather with the time-major transpose folded into the indices.
    x = jnp.take(params["embed"], tokens.T, axis=0).astype(jnp.float32)  # (T, B, E)

    w0, b0 = fuse_bilstm_params(params["l0_fwd"], params["l0_bwd"])
    w1, b1 = fuse_bilstm_params(params["l1_fwd"], params["l1_bwd"])
    h1 = bilstm_layer(x, w0, b0)    # (T, B, 2H)
    h2 = bilstm_layer(h1, w1, b1)   # (T, B, 2H)

    # Dropout: identity (eval).
    # Packed ordering for equal-length sequences = time-major flatten.
    h_packed = h2.reshape(T * B, -1)                          # (N, hidden_size)
    y_packed = labels.T.reshape(T * B, 1).astype(jnp.int32)   # (N, 1)
    return classifier_ce(h_packed, params["clf_w"], params["clf_b"], y_packed)


# ----------------------------------------------------------------------------
# Pure-JAX reference for verification.
# ----------------------------------------------------------------------------
def ref_lstm_dir(x, w_ih, w_hh, b):
    T, B, _ = x.shape
    H = w_hh.shape[0]
    h = jnp.zeros((B, H), jnp.float32)
    c = jnp.zeros((B, H), jnp.float32)
    outs = []
    for t in range(T):
        gates = x[t] @ w_ih + h @ w_hh + b
        i_g = jax.nn.sigmoid(gates[:, :H])
        f_g = jax.nn.sigmoid(gates[:, H:2 * H])
        g_g = jnp.tanh(gates[:, 2 * H:3 * H])
        o_g = jax.nn.sigmoid(gates[:, 3 * H:])
        c = f_g * c + i_g * g_g
        h = o_g * jnp.tanh(c)
        outs.append(h)
    return jnp.stack(outs)


def ref_forward(tokens, labels, params):
    B, T = tokens.shape
    emb = jnp.take(params["embed"], tokens, axis=0)
    x = jnp.transpose(emb, (1, 0, 2)).astype(jnp.float32)

    def bilayer(xx, pf, pb):
        hf = ref_lstm_dir(xx, *pf)
        hb = ref_lstm_dir(xx[::-1], *pb)[::-1]
        return jnp.concatenate([hf, hb], axis=-1)

    h2 = bilayer(bilayer(x, params["l0_fwd"], params["l0_bwd"]),
                 params["l1_fwd"], params["l1_bwd"])
    h_packed = h2.reshape(T * B, -1)
    logits = h_packed @ params["clf_w"] + params["clf_b"]
    y_packed = jnp.transpose(labels, (1, 0)).reshape(T * B)
    logp = jax.nn.log_softmax(logits, axis=-1)
    return -jnp.mean(jnp.take_along_axis(logp, y_packed[:, None], axis=1))


# ----------------------------------------------------------------------------
# Deterministic parameter init (shapes from NerLSTM.__init__).
# ----------------------------------------------------------------------------
def init_params(key, vocab_size, embed_size, hidden_size, num_tags):
    H = hidden_size // 2  # per-direction hidden
    keys = jax.random.split(key, 16)
    k = iter(keys)

    def lin(kk, shape, scale=0.1):
        return jax.random.normal(kk, shape, jnp.float32) * scale

    def lstm_dir(d_in):
        # Kernel layout: W_ih (d_in, 4H), W_hh (H, 4H), bias (1, 4H) = b_ih + b_hh
        return (lin(next(k), (d_in, 4 * H)),
                lin(next(k), (H, 4 * H)),
                lin(next(k), (1, 4 * H)))

    params = {
        "embed": lin(next(k), (vocab_size, embed_size), 1.0),
        "l0_fwd": lstm_dir(embed_size),
        "l0_bwd": lstm_dir(embed_size),
        "l1_fwd": lstm_dir(hidden_size),
        "l1_bwd": lstm_dir(hidden_size),
        "clf_w": lin(next(k), (hidden_size, num_tags)),
        "clf_b": lin(next(k), (1, num_tags)),
    }
    return params


if __name__ == "__main__":
    # Small config: vocab=32, embed=16, hidden=32 (=> 16 per direction),
    # num_tags=5, batch=2, seq=8.
    VOCAB, EMBED, HIDDEN, NUM_TAGS = 32, 16, 32, 5
    B, T = 2, 8

    key = jax.random.PRNGKey(0)
    kp, kx, ky = jax.random.split(key, 3)
    params = init_params(kp, VOCAB, EMBED, HIDDEN, NUM_TAGS)

    tokens = jax.random.randint(kx, (B, T), 0, VOCAB, dtype=jnp.int32)
    labels = jax.random.randint(ky, (B, T), 0, NUM_TAGS, dtype=jnp.int32)

    loss = jax.block_until_ready(ner_lstm_forward(tokens, labels, params))
    loss_ref = jax.block_until_ready(ref_forward(tokens, labels, params))
    assert jnp.allclose(loss, loss_ref, rtol=1e-4, atol=1e-5), (loss, loss_ref)

    print("KERNEL_OK")
</pallas_src>

<mosaic_0001>
module attributes {stable_mosaic.version = 11 : i64} {
  func.func @bilstm_kernel(%arg0: memref<8x2x16xf32, #tpu.memory_space<vmem>>, %arg1: memref<32x128xf32, #tpu.memory_space<vmem>>, %arg2: memref<1x128xf32, #tpu.memory_space<vmem>>, %arg3: memref<8x2x32xf32, #tpu.memory_space<vmem>>, %arg4: memref<4x16xf32, #tpu.memory_space<vmem>>, %arg5: memref<4x16xf32, #tpu.memory_space<vmem>>) attributes {dimension_semantics = [], scalar_prefetch = 0 : i64, scratch_operands = 2 : i64, tpu.core_type = #tpu.core_type<tc>} {
    %cst = arith.constant 0.000000e+00 : f32
    %0 = vector.broadcast %cst : f32 to vector<4x16xf32>
    %c0 = arith.constant 0 : index
    %c0_0 = arith.constant 0 : index
    %1 = vector.load %arg4[%c0, %c0_0] : memref<4x16xf32, #tpu.memory_space<vmem>>, vector<4x16xf32>
    tpu.vector_store %arg4[%c0, %c0_0], %0 {strides = array<i32>} : memref<4x16xf32, #tpu.memory_space<vmem>>, vector<4x16xf32>,
    %cst_1 = arith.constant 0.000000e+00 : f32
    %2 = vector.broadcast %cst_1 : f32 to vector<4x16xf32>
    %c0_2 = arith.constant 0 : index
    %c0_3 = arith.constant 0 : index
    %3 = vector.load %arg5[%c0_2, %c0_3] : memref<4x16xf32, #tpu.memory_space<vmem>>, vector<4x16xf32>
    tpu.vector_store %arg5[%c0_2, %c0_3], %2 {strides = array<i32>} : memref<4x16xf32, #tpu.memory_space<vmem>>, vector<4x16xf32>,
    %c0_i32 = arith.constant 0 : i32
    %c7_i32 = arith.constant 7 : i32
    %4 = arith.subi %c7_i32, %c0_i32 : i32
    %5 = arith.index_cast %c0_i32 : i32 to index
    %c0_4 = arith.constant 0 : index
    %c0_5 = arith.constant 0 : index
    %6 = vector.load %arg0[%5, %c0_4, %c0_5] : memref<8x2x16xf32, #tpu.memory_space<vmem>>, vector<1x2x16xf32>
    %7 = vector.shape_cast %6 : vector<1x2x16xf32> to vector<2x16xf32>
    %8 = arith.index_cast %4 : i32 to index
    %c0_6 = arith.constant 0 : index
    %c0_7 = arith.constant 0 : index
    %9 = vector.load %arg0[%8, %c0_6, %c0_7] : memref<8x2x16xf32, #tpu.memory_space<vmem>>, vector<1x2x16xf32>
    %10 = vector.shape_cast %9 : vector<1x2x16xf32> to vector<2x16xf32>
    %11 = tpu.concatenate %7, %10 in 0 : vector<2x16xf32>, vector<2x16xf32> -> vector<4x16xf32>
    %c0_8 = arith.constant 0 : index
    %c0_9 = arith.constant 0 : index
    %12 = vector.load %arg4[%c0_8, %c0_9] : memref<4x16xf32, #tpu.memory_space<vmem>>, vector<4x16xf32>
    %13 = tpu.concatenate %11, %12 in 1 : vector<4x16xf32>, vector<4x16xf32> -> vector<4x32xf32>
    %c0_10 = arith.constant 0 : index
    %c0_11 = arith.constant 0 : index
    %14 = vector.load %arg1[%c0_10, %c0_11] : memref<32x128xf32, #tpu.memory_space<vmem>>, vector<32x128xf32>
    %cst_12 = arith.constant dense<0.000000e+00> : vector<4x128xf32>
    %15 = tpu.matmul %13, %14, %cst_12 {dimension_numbers = #tpu.dot_dimension_numbers<[1], [0], [0], [1], [0, 0, 1, 1], [], []>} : vector<4x32xf32>, vector<32x128xf32>, vector<4x128xf32> -> vector<4x128xf32>
    %c0_13 = arith.constant 0 : index
    %c0_14 = arith.constant 0 : index
    %16 = vector.load %arg2[%c0_13, %c0_14] : memref<1x128xf32, #tpu.memory_space<vmem>>, vector<1x128xf32>
    %17 = vector.broadcast %16 : vector<1x128xf32> to vector<4x128xf32>
    %18 = arith.addf %15, %17 : vector<4x128xf32>
    %19 = vector.extract_strided_slice %18 {offsets = [0, 0], sizes = [2, 64], strides = [1, 1]} : vector<4x128xf32> to vector<2x64xf32>
    %20 = vector.extract_strided_slice %18 {offsets = [2, 64], sizes = [2, 64], strides = [1, 1]} : vector<4x128xf32> to vector<2x64xf32>
    %21 = tpu.concatenate %19, %20 in 0 : vector<2x64xf32>, vector<2x64xf32> -> vector<4x64xf32>
    %22 = vector.extract_strided_slice %21 {offsets = [0, 0], sizes = [4, 16], strides = [1, 1]} : vector<4x64xf32> to vector<4x16xf32>
    %23 = arith.negf %22 : vector<4x16xf32>
    %24 = math.exp %23 : vector<4x16xf32>
    %cst_15 = arith.constant 1.000000e+00 : f32
    %25 = vector.broadcast %cst_15 : f32 to vector<4x16xf32>
    %26 = arith.addf %25, %24 : vector<4x16xf32>
    %27 = arith.divf %25, %26 : vector<4x16xf32>
    %28 = vector.extract_strided_slice %21 {offsets = [0, 16], sizes = [4, 16], strides = [1, 1]} : vector<4x64xf32> to vector<4x16xf32>
    %29 = arith.negf %28 : vector<4x16xf32>
    %30 = math.exp %29 : vector<4x16xf32>
    %cst_16 = arith.constant 1.000000e+00 : f32
    %31 = vector.broadcast %cst_16 : f32 to vector<4x16xf32>
    %32 = arith.addf %31, %30 : vector<4x16xf32>
    %33 = arith.divf %31, %32 : vector<4x16xf32>
    %34 = vector.extract_strided_slice %21 {offsets = [0, 32], sizes = [4, 16], strides = [1, 1]} : vector<4x64xf32> to vector<4x16xf32>
    %35 = math.tanh %34 : vector<4x16xf32>
    %36 = vector.extract_strided_slice %21 {offsets = [0, 48], sizes = [4, 16], strides = [1, 1]} : vector<4x64xf32> to vector<4x16xf32>
    %37 = arith.negf %36 : vector<4x16xf32>
    %38 = math.exp %37 : vector<4x16xf32>
    %cst_17 = arith.constant 1.000000e+00 : f32
    %39 = vector.broadcast %cst_17 : f32 to vector<4x16xf32>
    %40 = arith.addf %39, %38 : vector<4x16xf32>
    %41 = arith.divf %39, %40 : vector<4x16xf32>
    %c0_18 = arith.constant 0 : index
    %c0_19 = arith.constant 0 : index
    %42 = vector.load %arg5[%c0_18, %c0_19] : memref<4x16xf32, #tpu.memory_space<vmem>>, vector<4x16xf32>
    %43 = arith.mulf %33, %42 : vector<4x16xf32>
    %44 = arith.mulf %27, %35 : vector<4x16xf32>
    %45 = arith.addf %43, %44 : vector<4x16xf32>
    %46 = math.tanh %45 : vector<4x16xf32>
    %47 = arith.mulf %41, %46 : vector<4x16xf32>
    %c0_20 = arith.constant 0 : index
    %c0_21 = arith.constant 0 : index
    %48 = vector.load %arg4[%c0_20, %c0_21] : memref<4x16xf32, #tpu.memory_space<vmem>>, vector<4x16xf32>
    tpu.vector_store %arg4[%c0_20, %c0_21], %47 {strides = array<i32>} : memref<4x16xf32, #tpu.memory_space<vmem>>, vector<4x16xf32>,
    %c0_22 = arith.constant 0 : index
    %c0_23 = arith.constant 0 : index
    %49 = vector.load %arg5[%c0_22, %c0_23] : memref<4x16xf32, #tpu.memory_space<vmem>>, vector<4x16xf32>
    tpu.vector_store %arg5[%c0_22, %c0_23], %45 {strides = array<i32>} : memref<4x16xf32, #tpu.memory_space<vmem>>, vector<4x16xf32>,
    %50 = vector.extract_strided_slice %47 {offsets = [0, 0], sizes = [2, 16], strides = [1, 1]} : vector<4x16xf32> to vector<2x16xf32>
    %51 = arith.index_cast %c0_i32 : i32 to index
    %c0_24 = arith.constant 0 : index
    %c0_25 = arith.constant 0 : index
    %52 = vector.load %arg3[%51, %c0_24, %c0_25] : memref<8x2x32xf32, #tpu.memory_space<vmem>>, vector<1x2x16xf32>
    %53 = vector.shape_cast %52 : vector<1x2x16xf32> to vector<2x16xf32>
    %54 = vector.shape_cast %50 : vector<2x16xf32> to vector<1x2x16xf32>
    tpu.vector_store %arg3[%51, %c0_24, %c0_25], %54 {strides = array<i32>} : memref<8x2x32xf32, #tpu.memory_space<vmem>>, vector<1x2x16xf32>,
    %55 = vector.extract_strided_slice %47 {offsets = [2, 0], sizes = [2, 16], strides = [1, 1]} : vector<4x16xf32> to vector<2x16xf32>
    %56 = arith.index_cast %4 : i32 to index
    %c0_26 = arith.constant 0 : index
    %c16 = arith.constant 16 : index
    %57 = vector.load %arg3[%56, %c0_26, %c16] : memref<8x2x32xf32, #tpu.memory_space<vmem>>, vector<1x2x16xf32>
    %58 = vector.shape_cast %57 : vector<1x2x16xf32> to vector<2x16xf32>
    %59 = vector.shape_cast %55 : vector<2x16xf32> to vector<1x2x16xf32>
    tpu.vector_store %arg3[%56, %c0_26, %c16], %59 {strides = array<i32>} : memref<8x2x32xf32, #tpu.memory_space<vmem>>, vector<1x2x16xf32>,
    %c1_i32 = arith.constant 1 : i32
    %c7_i32_27 = arith.constant 7 : i32
    %60 = arith.subi %c7_i32_27, %c1_i32 : i32
    %61 = arith.index_cast %c1_i32 : i32 to index
    %c0_28 = arith.constant 0 : index
    %c0_29 = arith.constant 0 : index
    %62 = vector.load %arg0[%61, %c0_28, %c0_29] : memref<8x2x16xf32, #tpu.memory_space<vmem>>, vector<1x2x16xf32>
    %63 = vector.shape_cast %62 : vector<1x2x16xf32> to vector<2x16xf32>
    %64 = arith.index_cast %60 : i32 to index
    %c0_30 = arith.constant 0 : index
    %c0_31 = arith.constant 0 : index
    %65 = vector.load %arg0[%64, %c0_30, %c0_31] : memref<8x2x16xf32, #tpu.memory_space<vmem>>, vector<1x2x16xf32>
    %66 = vector.shape_cast %65 : vector<1x2x16xf32> to vector<2x16xf32>
    %67 = tpu.concatenate %63, %66 in 0 : vector<2x16xf32>, vector<2x16xf32> -> vector<4x16xf32>
    %c0_32 = arith.constant 0 : index
    %c0_33 = arith.constant 0 : index
    %68 = vector.load %arg4[%c0_32, %c0_33] : memref<4x16xf32, #tpu.memory_space<vmem>>, vector<4x16xf32>
    %69 = tpu.concatenate %67, %68 in 1 : vector<4x16xf32>, vector<4x16xf32> -> vector<4x32xf32>
    %c0_34 = arith.constant 0 : index
    %c0_35 = arith.constant 0 : index
    %70 = vector.load %arg1[%c0_34, %c0_35] : memref<32x128xf32, #tpu.memory_space<vmem>>, vector<32x128xf32>
    %cst_36 = arith.constant dense<0.000000e+00> : vector<4x128xf32>
    %71 = tpu.matmul %69, %70, %cst_36 {dimension_numbers = #tpu.dot_dimension_numbers<[1], [0], [0], [1], [0, 0, 1, 1], [], []>} : vector<4x32xf32>, vector<32x128xf32>, vector<4x128xf32> -> vector<4x128xf32>
    %c0_37 = arith.constant 0 : index
    %c0_38 = arith.constant 0 : index
    %72 = vector.load %arg2[%c0_37, %c0_38] : memref<1x128xf32, #tpu.memory_space<vmem>>, vector<1x128xf32>
    %73 = vector.broadcast %72 : vector<1x128xf32> to vector<4x128xf32>
    %74 = arith.addf %71, %73 : vector<4x128xf32>
    %75 = vector.extract_strided_slice %74 {offsets = [0, 0], sizes = [2, 64], strides = [1, 1]} : vector<4x128xf32> to vector<2x64xf32>
    %76 = vector.extract_strided_slice %74 {offsets = [2, 64], sizes = [2, 64], strides = [1, 1]} : vector<4x128xf32> to vector<2x64xf32>
    %77 = tpu.concatenate %75, %76 in 0 : vector<2x64xf32>, vector<2x64xf32> -> vector<4x64xf32>
    %78 = vector.extract_strided_slice %77 {offsets = [0, 0], sizes = [4, 16], strides = [1, 1]} : vector<4x64xf32> to vector<4x16xf32>
    %79 = arith.negf %78 : vector<4x16xf32>
    %80 = math.exp %79 : vector<4x16xf32>
    %cst_39 = arith.constant 1.000000e+00 : f32
    %81 = vector.broadcast %cst_39 : f32 to vector<4x16xf32>
    %82 = arith.addf %81, %80 : vector<4x16xf32>
    %83 = arith.divf %81, %82 : vector<4x16xf32>
    %84 = vector.extract_strided_slice %77 {offsets = [0, 16], sizes = [4, 16], strides = [1, 1]} : vector<4x64xf32> to vector<4x16xf32>
    %85 = arith.negf %84 : vector<4x16xf32>
    %86 = math.exp %85 : vector<4x16xf32>
    %cst_40 = arith.constant 1.000000e+00 : f32
    %87 = vector.broadcast %cst_40 : f32 to vector<4x16xf32>
    %88 = arith.addf %87, %86 : vector<4x16xf32>
    %89 = arith.divf %87, %88 : vector<4x16xf32>
    %90 = vector.extract_strided_slice %77 {offsets = [0, 32], sizes = [4, 16], strides = [1, 1]} : vector<4x64xf32> to vector<4x16xf32>
    %91 = math.tanh %90 : vector<4x16xf32>
    %92 = vector.extract_strided_slice %77 {offsets = [0, 48], sizes = [4, 16], strides = [1, 1]} : vector<4x64xf32> to vector<4x16xf32>
    %93 = arith.negf %92 : vector<4x16xf32>
    %94 = math.exp %93 : vector<4x16xf32>
    %cst_41 = arith.constant 1.000000e+00 : f32
    %95 = vector.broadcast %cst_41 : f32 to vector<4x16xf32>
    %96 = arith.addf %95, %94 : vector<4x16xf32>
    %97 = arith.divf %95, %96 : vector<4x16xf32>
    %c0_42 = arith.constant 0 : index
    %c0_43 = arith.constant 0 : index
    %98 = vector.load %arg5[%c0_42, %c0_43] : memref<4x16xf32, #tpu.memory_space<vmem>>, vector<4x16xf32>
    %99 = arith.mulf %89, %98 : vector<4x16xf32>
    %100 = arith.mulf %83, %91 : vector<4x16xf32>
    %101 = arith.addf %99, %100 : vector<4x16xf32>
    %102 = math.tanh %101 : vector<4x16xf32>
    %103 = arith.mulf %97, %102 : vector<4x16xf32>
    %c0_44 = arith.constant 0 : index
    %c0_45 = arith.constant 0 : index
    %104 = vector.load %arg4[%c0_44, %c0_45] : memref<4x16xf32, #tpu.memory_space<vmem>>, vector<4x16xf32>
    tpu.vector_store %arg4[%c0_44, %c0_45], %103 {strides = array<i32>} : memref<4x16xf32, #tpu.memory_space<vmem>>, vector<4x16xf32>,
    %c0_46 = arith.constant 0 : index
    %c0_47 = arith.constant 0 : index
    %105 = vector.load %arg5[%c0_46, %c0_47] : memref<4x16xf32, #tpu.memory_space<vmem>>, vector<4x16xf32>
    tpu.vector_store %arg5[%c0_46, %c0_47], %101 {strides = array<i32>} : memref<4x16xf32, #tpu.memory_space<vmem>>, vector<4x16xf32>,
    %106 = vector.extract_strided_slice %103 {offsets = [0, 0], sizes = [2, 16], strides = [1, 1]} : vector<4x16xf32> to vector<2x16xf32>
    %107 = arith.index_cast %c1_i32 : i32 to index
    %c0_48 = arith.constant 0 : index
    %c0_49 = arith.constant 0 : index
    %108 = vector.load %arg3[%107, %c0_48, %c0_49] : memref<8x2x32xf32, #tpu.memory_space<vmem>>, vector<1x2x16xf32>
    %109 = vector.shape_cast %108 : vector<1x2x16xf32> to vector<2x16xf32>
    %110 = vector.shape_cast %106 : vector<2x16xf32> to vector<1x2x16xf32>
    tpu.vector_store %arg3[%107, %c0_48, %c0_49], %110 {strides = array<i32>} : memref<8x2x32xf32, #tpu.memory_space<vmem>>, vector<1x2x16xf32>,
    %111 = vector.extract_strided_slice %103 {offsets = [2, 0], sizes = [2, 16], strides = [1, 1]} : vector<4x16xf32> to vector<2x16xf32>
    %112 = arith.index_cast %60 : i32 to index
    %c0_50 = arith.constant 0 : index
    %c16_51 = arith.constant 16 : index
    %113 = vector.load %arg3[%112, %c0_50, %c16_51] : memref<8x2x32xf32, #tpu.memory_space<vmem>>, vector<1x2x16xf32>
    %114 = vector.shape_cast %113 : vector<1x2x16xf32> to vector<2x16xf32>
    %115 = vector.shape_cast %111 : vector<2x16xf32> to vector<1x2x16xf32>
    tpu.vector_store %arg3[%112, %c0_50, %c16_51], %115 {strides = array<i32>} : memref<8x2x32xf32, #tpu.memory_space<vmem>>, vector<1x2x16xf32>,
    %c2_i32 = arith.constant 2 : i32
    %c7_i32_52 = arith.constant 7 : i32
    %116 = arith.subi %c7_i32_52, %c2_i32 : i32
    %117 = arith.index_cast %c2_i32 : i32 to index
    %c0_53 = arith.constant 0 : index
    %c0_54 = arith.constant 0 : index
    %118 = vector.load %arg0[%117, %c0_53, %c0_54] : memref<8x2x16xf32, #tpu.memory_space<vmem>>, vector<1x2x16xf32>
    %119 = vector.shape_cast %118 : vector<1x2x16xf32> to vector<2x16xf32>
    %120 = arith.index_cast %116 : i32 to index
    %c0_55 = arith.constant 0 : index
    %c0_56 = arith.constant 0 : index
    %121 = vector.load %arg0[%120, %c0_55, %c0_56] : memref<8x2x16xf32, #tpu.memory_space<vmem>>, vector<1x2x16xf32>
    %122 = vector.shape_cast %121 : vector<1x2x16xf32> to vector<2x16xf32>
    %123 = tpu.concatenate %119, %122 in 0 : vector<2x16xf32>, vector<2x16xf32> -> vector<4x16xf32>
    %c0_57 = arith.constant 0 : index
    %c0_58 = arith.constant 0 : index
    %124 = vector.load %arg4[%c0_57, %c0_58] : memref<4x16xf32, #tpu.memory_space<vmem>>, vector<4x16xf32>
    %125 = tpu.concatenate %123, %124 in 1 : vector<4x16xf32>, vector<4x16xf32> -> vector<4x32xf32>
    %c0_59 = arith.constant 0 : index
    %c0_60 = arith.constant 0 : index
    %126 = vector.load %arg1[%c0_59, %c0_60] : memref<32x128xf32, #tpu.memory_space<vmem>>, vector<32x128xf32>
    %cst_61 = arith.constant dense<0.000000e+00> : vector<4x128xf32>
    %127 = tpu.matmul %125, %126, %cst_61 {dimension_numbers = #tpu.dot_dimension_numbers<[1], [0], [0], [1], [0, 0, 1, 1], [], []>} : vector<4x32xf32>, vector<32x128xf32>, vector<4x128xf32> -> vector<4x128xf32>
    %c0_62 = arith.constant 0 : index
    %c0_63 = arith.constant 0 : index
    %128 = vector.load %arg2[%c0_62, %c0_63] : memref<1x128xf32, #tpu.memory_space<vmem>>, vector<1x128xf32>
    %129 = vector.broadcast %128 : vector<1x128xf32> to vector<4x128xf32>
    %130 = arith.addf %127, %129 : vector<4x128xf32>
    %131 = vector.extract_strided_slice %130 {offsets = [0, 0], sizes = [2, 64], strides = [1, 1]} : vector<4x128xf32> to vector<2x64xf32>
    %132 = vector.extract_strided_slice %130 {offsets = [2, 64], sizes = [2, 64], strides = [1, 1]} : vector<4x128xf32> to vector<2x64xf32>
    %133 = tpu.concatenate %131, %132 in 0 : vector<2x64xf32>, vector<2x64xf32> -> vector<4x64xf32>
    %134 = vector.extract_strided_slice %133 {offsets = [0, 0], sizes = [4, 16], strides = [1, 1]} : vector<4x64xf32> to vector<4x16xf32>
    %135 = arith.negf %134 : vector<4x16xf32>
    %136 = math.exp %135 : vector<4x16xf32>
    %cst_64 = arith.constant 1.000000e+00 : f32
    %137 = vector.broadcast %cst_64 : f32 to vector<4x16xf32>
    %138 = arith.addf %137, %136 : vector<4x16xf32>
    %139 = arith.divf %137, %138 : vector<4x16xf32>
    %140 = vector.extract_strided_slice %133 {offsets = [0, 16], sizes = [4, 16], strides = [1, 1]} : vector<4x64xf32> to vector<4x16xf32>
    %141 = arith.negf %140 : vector<4x16xf32>
    %142 = math.exp %141 : vector<4x16xf32>
    %cst_65 = arith.constant 1.000000e+00 : f32
    %143 = vector.broadcast %cst_65 : f32 to vector<4x16xf32>
    %144 = arith.addf %143, %142 : vector<4x16xf32>
    %145 = arith.divf %143, %144 : vector<4x16xf32>
    %146 = vector.extract_strided_slice %133 {offsets = [0, 32], sizes = [4, 16], strides = [1, 1]} : vector<4x64xf32> to vector<4x16xf32>
    %147 = math.tanh %146 : vector<4x16xf32>
    %148 = vector.extract_strided_slice %133 {offsets = [0, 48], sizes = [4, 16], strides = [1, 1]} : vector<4x64xf32> to vector<4x16xf32>
    %149 = arith.negf %148 : vector<4x16xf32>
    %150 = math.exp %149 : vector<4x16xf32>
    %cst_66 = arith.constant 1.000000e+00 : f32
    %151 = vector.broadcast %cst_66 : f32 to vector<4x16xf32>
    %152 = arith.addf %151, %150 : vector<4x16xf32>
    %153 = arith.divf %151, %152 : vector<4x16xf32>
    %c0_67 = arith.constant 0 : index
    %c0_68 = arith.constant 0 : index
    %154 = vector.load %arg5[%c0_67, %c0_68] : memref<4x16xf32, #tpu.memory_space<vmem>>, vector<4x16xf32>
    %155 = arith.mulf %145, %154 : vector<4x16xf32>
    %156 = arith.mulf %139, %147 : vector<4x16xf32>
    %157 = arith.addf %155, %156 : vector<4x16xf32>
    %158 = math.tanh %157 : vector<4x16xf32>
    %159 = arith.mulf %153, %158 : vector<4x16xf32>
    %c0_69 = arith.constant 0 : index
    %c0_70 = arith.constant 0 : index
    %160 = vector.load %arg4[%c0_69, %c0_70] : memref<4x16xf32, #tpu.memory_space<vmem>>, vector<4x16xf32>
    tpu.vector_store %arg4[%c0_69, %c0_70], %159 {strides = array<i32>} : memref<4x16xf32, #tpu.memory_space<vmem>>, vector<4x16xf32>,
    %c0_71 = arith.constant 0 : index
    %c0_72 = arith.constant 0 : index
    %161 = vector.load %arg5[%c0_71, %c0_72] : memref<4x16xf32, #tpu.memory_space<vmem>>, vector<4x16xf32>
    tpu.vector_store %arg5[%c0_71, %c0_72], %157 {strides = array<i32>} : memref<4x16xf32, #tpu.memory_space<vmem>>, vector<4x16xf32>,
    %162 = vector.extract_strided_slice %159 {offsets = [0, 0], sizes = [2, 16], strides = [1, 1]} : vector<4x16xf32> to vector<2x16xf32>
    %163 = arith.index_cast %c2_i32 : i32 to index
    %c0_73 = arith.constant 0 : index
    %c0_74 = arith.constant 0 : index
    %164 = vector.load %arg3[%163, %c0_73, %c0_74] : memref<8x2x32xf32, #tpu.memory_space<vmem>>, vector<1x2x16xf32>
    %165 = vector.shape_cast %164 : vector<1x2x16xf32> to vector<2x16xf32>
    %166 = vector.shape_cast %162 : vector<2x16xf32> to vector<1x2x16xf32>
    tpu.vector_store %arg3[%163, %c0_73, %c0_74], %166 {strides = array<i32>} : memref<8x2x32xf32, #tpu.memory_space<vmem>>, vector<1x2x16xf32>,
    %167 = vector.extract_strided_slice %159 {offsets = [2, 0], sizes = [2, 16], strides = [1, 1]} : vector<4x16xf32> to vector<2x16xf32>
    %168 = arith.index_cast %116 : i32 to index
    %c0_75 = arith.constant 0 : index
    %c16_76 = arith.constant 16 : index
    %169 = vector.load %arg3[%168, %c0_75, %c16_76] : memref<8x2x32xf32, #tpu.memory_space<vmem>>, vector<1x2x16xf32>
    %170 = vector.shape_cast %169 : vector<1x2x16xf32> to vector<2x16xf32>
    %171 = vector.shape_cast %167 : vector<2x16xf32> to vector<1x2x16xf32>
    tpu.vector_store %arg3[%168, %c0_75, %c16_76], %171 {strides = array<i32>} : memref<8x2x32xf32, #tpu.memory_space<vmem>>, vector<1x2x16xf32>,
    %c3_i32 = arith.constant 3 : i32
    %c7_i32_77 = arith.constant 7 : i32
    %172 = arith.subi %c7_i32_77, %c3_i32 : i32
    %173 = arith.index_cast %c3_i32 : i32 to index
    %c0_78 = arith.constant 0 : index
    %c0_79 = arith.constant 0 : index
    %174 = vector.load %arg0[%173, %c0_78, %c0_79] : memref<8x2x16xf32, #tpu.memory_space<vmem>>, vector<1x2x16xf32>
    %175 = vector.shape_cast %174 : vector<1x2x16xf32> to vector<2x16xf32>
    %176 = arith.index_cast %172 : i32 to index
    %c0_80 = arith.constant 0 : index
    %c0_81 = arith.constant 0 : index
    %177 = vector.load %arg0[%176, %c0_80, %c0_81] : memref<8x2x16xf32, #tpu.memory_space<vmem>>, vector<1x2x16xf32>
    %178 = vector.shape_cast %177 : vector<1x2x16xf32> to vector<2x16xf32>
    %179 = tpu.concatenate %175, %178 in 0 : vector<2x16xf32>, vector<2x16xf32> -> vector<4x16xf32>
    %c0_82 = arith.constant 0 : index
    %c0_83 = arith.constant 0 : index
    %180 = vector.load %arg4[%c0_82, %c0_83] : memref<4x16xf32, #tpu.memory_space<vmem>>, vector<4x16xf32>
    %181 = tpu.concatenate %179, %180 in 1 : vector<4x16xf32>, vector<4x16xf32> -> vector<4x32xf32>
    %c0_84 = arith.constant 0 : index
    %c0_85 = arith.constant 0 : index
    %182 = vector.load %arg1[%c0_84, %c0_85] : memref<32x128xf32, #tpu.memory_space<vmem>>, vector<32x128xf32>
    %cst_86 = arith.constant dense<0.000000e+00> : vector<4x128xf32>
    %183 = tpu.matmul %181, %182, %cst_86 {dimension_numbers = #tpu.dot_dimension_numbers<[1], [0], [0], [1], [0, 0, 1, 1], [], []>} : vector<4x32xf32>, vector<32x128xf32>, vector<4x128xf32> -> vector<4x128xf32>
    %c0_87 = arith.constant 0 : index
    %c0_88 = arith.constant 0 : index
    %184 = vector.load %arg2[%c0_87, %c0_88] : memref<1x128xf32, #tpu.memory_space<vmem>>, vector<1x128xf32>
    %185 = vector.broadcast %184 : vector<1x128xf32> to vector<4x128xf32>
    %186 = arith.addf %183, %185 : vector<4x128xf32>
    %187 = vector.extract_strided_slice %186 {offsets = [0, 0], sizes = [2, 64], strides = [1, 1]} : vector<4x128xf32> to vector<2x64xf32>
    %188 = vector.extract_strided_slice %186 {offsets = [2, 64], sizes = [2, 64], strides = [1, 1]} : vector<4x128xf32> to vector<2x64xf32>
    %189 = tpu.concatenate %187, %188 in 0 : vector<2x64xf32>, vector<2x64xf32> -> vector<4x64xf32>
    %190 = vector.extract_strided_slice %189 {offsets = [0, 0], sizes = [4, 16], strides = [1, 1]} : vector<4x64xf32> to vector<4x16xf32>
    %191 = arith.negf %190 : vector<4x16xf32>
    %192 = math.exp %191 : vector<4x16xf32>
    %cst_89 = arith.constant 1.000000e+00 : f32
    %193 = vector.broadcast %cst_89 : f32 to vector<4x16xf32>
    %194 = arith.addf %193, %192 : vector<4x16xf32>
    %195 = arith.divf %193, %194 : vector<4x16xf32>
    %196 = vector.extract_strided_slice %189 {offsets = [0, 16], sizes = [4, 16], strides = [1, 1]} : vector<4x64xf32> to vector<4x16xf32>
    %197 = arith.negf %196 : vector<4x16xf32>
    %198 = math.exp %197 : vector<4x16xf32>
    %cst_90 = arith.constant 1.000000e+00 : f32
    %199 = vector.broadcast %cst_90 : f32 to vector<4x16xf32>
    %200 = arith.addf %199, %198 : vector<4x16xf32>
    %201 = arith.divf %199, %200 : vector<4x16xf32>
    %202 = vector.extract_strided_slice %189 {offsets = [0, 32], sizes = [4, 16], strides = [1, 1]} : vector<4x64xf32> to vector<4x16xf32>
    %203 = math.tanh %202 : vector<4x16xf32>
    %204 = vector.extract_strided_slice %189 {offsets = [0, 48], sizes = [4, 16], strides = [1, 1]} : vector<4x64xf32> to vector<4x16xf32>
    %205 = arith.negf %204 : vector<4x16xf32>
    %206 = math.exp %205 : vector<4x16xf32>
    %cst_91 = arith.constant 1.000000e+00 : f32
    %207 = vector.broadcast %cst_91 : f32 to vector<4x16xf32>
    %208 = arith.addf %207, %206 : vector<4x16xf32>
    %209 = arith.divf %207, %208 : vector<4x16xf32>
    %c0_92 = arith.constant 0 : index
    %c0_93 = arith.constant 0 : index
    %210 = vector.load %arg5[%c0_92, %c0_93] : memref<4x16xf32, #tpu.memory_space<vmem>>, vector<4x16xf32>
    %211 = arith.mulf %201, %210 : vector<4x16xf32>
    %212 = arith.mulf %195, %203 : vector<4x16xf32>
    %213 = arith.addf %211, %212 : vector<4x16xf32>
    %214 = math.tanh %213 : vector<4x16xf32>
    %215 = arith.mulf %209, %214 : vector<4x16xf32>
    %c0_94 = arith.constant 0 : index
    %c0_95 = arith.constant 0 : index
    %216 = vector.load %arg4[%c0_94, %c0_95] : memref<4x16xf32, #tpu.memory_space<vmem>>, vector<4x16xf32>
    tpu.vector_store %arg4[%c0_94, %c0_95], %215 {strides = array<i32>} : memref<4x16xf32, #tpu.memory_space<vmem>>, vector<4x16xf32>,
    %c0_96 = arith.constant 0 : index
    %c0_97 = arith.constant 0 : index
    %217 = vector.load %arg5[%c0_96, %c0_97] : memref<4x16xf32, #tpu.memory_space<vmem>>, vector<4x16xf32>
    tpu.vector_store %arg5[%c0_96, %c0_97], %213 {strides = array<i32>} : memref<4x16xf32, #tpu.memory_space<vmem>>, vector<4x16xf32>,
    %218 = vector.extract_strided_slice %215 {offsets = [0, 0], sizes = [2, 16], strides = [1, 1]} : vector<4x16xf32> to vector<2x16xf32>
    %219 = arith.index_cast %c3_i32 : i32 to index
    %c0_98 = arith.constant 0 : index
    %c0_99 = arith.constant 0 : index
    %220 = vector.load %arg3[%219, %c0_98, %c0_99] : memref<8x2x32xf32, #tpu.memory_space<vmem>>, vector<1x2x16xf32>
    %221 = vector.shape_cast %220 : vector<1x2x16xf32> to vector<2x16xf32>
    %222 = vector.shape_cast %218 : vector<2x16xf32> to vector<1x2x16xf32>
    tpu.vector_store %arg3[%219, %c0_98, %c0_99], %222 {strides = array<i32>} : memref<8x2x32xf32, #tpu.memory_space<vmem>>, vector<1x2x16xf32>,
    %223 = vector.extract_strided_slice %215 {offsets = [2, 0], sizes = [2, 16], strides = [1, 1]} : vector<4x16xf32> to vector<2x16xf32>
    %224 = arith.index_cast %172 : i32 to index
    %c0_100 = arith.constant 0 : index
    %c16_101 = arith.constant 16 : index
    %225 = vector.load %arg3[%224, %c0_100, %c16_101] : memref<8x2x32xf32, #tpu.memory_space<vmem>>, vector<1x2x16xf32>
    %226 = vector.shape_cast %225 : vector<1x2x16xf32> to vector<2x16xf32>
    %227 = vector.shape_cast %223 : vector<2x16xf32> to vector<1x2x16xf32>
    tpu.vector_store %arg3[%224, %c0_100, %c16_101], %227 {strides = array<i32>} : memref<8x2x32xf32, #tpu.memory_space<vmem>>, vector<1x2x16xf32>,
    %c4_i32 = arith.constant 4 : i32
    %c7_i32_102 = arith.constant 7 : i32
    %228 = arith.subi %c7_i32_102, %c4_i32 : i32
    %229 = arith.index_cast %c4_i32 : i32 to index
    %c0_103 = arith.constant 0 : index
    %c0_104 = arith.constant 0 : index
    %230 = vector.load %arg0[%229, %c0_103, %c0_104] : memref<8x2x16xf32, #tpu.memory_space<vmem>>, vector<1x2x16xf32>
    %231 = vector.shape_cast %230 : vector<1x2x16xf32> to vector<2x16xf32>
    %232 = arith.index_cast %228 : i32 to index
    %c0_105 = arith.constant 0 : index
    %c0_106 = arith.constant 0 : index
    %233 = vector.load %arg0[%232, %c0_105, %c0_106] : memref<8x2x16xf32, #tpu.memory_space<vmem>>, vector<1x2x16xf32>
    %234 = vector.shape_cast %233 : vector<1x2x16xf32> to vector<2x16xf32>
    %235 = tpu.concatenate %231, %234 in 0 : vector<2x16xf32>, vector<2x16xf32> -> vector<4x16xf32>
    %c0_107 = arith.constant 0 : index
    %c0_108 = arith.constant 0 : index
    %236 = vector.load %arg4[%c0_107, %c0_108] : memref<4x16xf32, #tpu.memory_space<vmem>>, vector<4x16xf32>
    %237 = tpu.concatenate %235, %236 in 1 : vector<4x16xf32>, vector<4x16xf32> -> vector<4x32xf32>
    %c0_109 = arith.constant 0 : index
    %c0_110 = arith.constant 0 : index
    %238 = vector.load %arg1[%c0_109, %c0_110] : memref<32x128xf32, #tpu.memory_space<vmem>>, vector<32x128xf32>
    %cst_111 = arith.constant dense<0.000000e+00> : vector<4x128xf32>
    %239 = tpu.matmul %237, %238, %cst_111 {dimension_numbers = #tpu.dot_dimension_numbers<[1], [0], [0], [1], [0, 0, 1, 1], [], []>} : vector<4x32xf32>, vector<32x128xf32>, vector<4x128xf32> -> vector<4x128xf32>
    %c0_112 = arith.constant 0 : index
    %c0_113 = arith.constant 0 : index
    %240 = vector.load %arg2[%c0_112, %c0_113] : memref<1x128xf32, #tpu.memory_space<vmem>>, vector<1x128xf32>
    %241 = vector.broadcast %240 : vector<1x128xf32> to vector<4x128xf32>
    %242 = arith.addf %239, %241 : vector<4x128xf32>
    %243 = vector.extract_strided_slice %242 {offsets = [0, 0], sizes = [2, 64], strides = [1, 1]} : vector<4x128xf32> to vector<2x64xf32>
    %244 = vector.extract_strided_slice %242 {offsets = [2, 64], sizes = [2, 64], strides = [1, 1]} : vector<4x128xf32> to vector<2x64xf32>
    %245 = tpu.concatenate %243, %244 in 0 : vector<2x64xf32>, vector<2x64xf32> -> vector<4x64xf32>
    %246 = vector.extract_strided_slice %245 {offsets = [0, 0], sizes = [4, 16], strides = [1, 1]} : vector<4x64xf32> to vector<4x16xf32>
    %247 = arith.negf %246 : vector<4x16xf32>
    %248 = math.exp %247 : vector<4x16xf32>
    %cst_114 = arith.constant 1.000000e+00 : f32
    %249 = vector.broadcast %cst_114 : f32 to vector<4x16xf32>
    %250 = arith.addf %249, %248 : vector<4x16xf32>
    %251 = arith.divf %249, %250 : vector<4x16xf32>
    %252 = vector.extract_strided_slice %245 {offsets = [0, 16], sizes = [4, 16], strides = [1, 1]} : vector<4x64xf32> to vector<4x16xf32>
    %253 = arith.negf %252 : vector<4x16xf32>
    %254 = math.exp %253 : vector<4x16xf32>
    %cst_115 = arith.constant 1.000000e+00 : f32
    %255 = vector.broadcast %cst_115 : f32 to vector<4x16xf32>
    %256 = arith.addf %255, %254 : vector<4x16xf32>
    %257 = arith.divf %255, %256 : vector<4x16xf32>
    %258 = vector.extract_strided_slice %245 {offsets = [0, 32], sizes = [4, 16], strides = [1, 1]} : vector<4x64xf32> to vector<4x16xf32>
    %259 = math.tanh %258 : vector<4x16xf32>
    %260 = vector.extract_strided_slice %245 {offsets = [0, 48], sizes = [4, 16], strides = [1, 1]} : vector<4x64xf32> to vector<4x16xf32>
    %261 = arith.negf %260 : vector<4x16xf32>
    %262 = math.exp %261 : vector<4x16xf32>
    %cst_116 = arith.constant 1.000000e+00 : f32
    %263 = vector.broadcast %cst_116 : f32 to vector<4x16xf32>
    %264 = arith.addf %263, %262 : vector<4x16xf32>
    %265 = arith.divf %263, %264 : vector<4x16xf32>
    %c0_117 = arith.constant 0 : index
    %c0_118 = arith.constant 0 : index
    %266 = vector.load %arg5[%c0_117, %c0_118] : memref<4x16xf32, #tpu.memory_space<vmem>>, vector<4x16xf32>
    %267 = arith.mulf %257, %266 : vector<4x16xf32>
    %268 = arith.mulf %251, %259 : vector<4x16xf32>
    %269 = arith.addf %267, %268 : vector<4x16xf32>
    %270 = math.tanh %269 : vector<4x16xf32>
    %271 = arith.mulf %265, %270 : vector<4x16xf32>
    %c0_119 = arith.constant 0 : index
    %c0_120 = arith.constant 0 : index
    %272 = vector.load %arg4[%c0_119, %c0_120] : memref<4x16xf32, #tpu.memory_space<vmem>>, vector<4x16xf32>
    tpu.vector_store %arg4[%c0_119, %c0_120], %271 {strides = array<i32>} : memref<4x16xf32, #tpu.memory_space<vmem>>, vector<4x16xf32>,
    %c0_121 = arith.constant 0 : index
    %c0_122 = arith.constant 0 : index
    %273 = vector.load %arg5[%c0_121, %c0_122] : memref<4x16xf32, #tpu.memory_space<vmem>>, vector<4x16xf32>
    tpu.vector_store %arg5[%c0_121, %c0_122], %269 {strides = array<i32>} : memref<4x16xf32, #tpu.memory_space<vmem>>, vector<4x16xf32>,
    %274 = vector.extract_strided_slice %271 {offsets = [0, 0], sizes = [2, 16], strides = [1, 1]} : vector<4x16xf32> to vector<2x16xf32>
    %275 = arith.index_cast %c4_i32 : i32 to index
    %c0_123 = arith.constant 0 : index
    %c0_124 = arith.constant 0 : index
    %276 = vector.load %arg3[%275, %c0_123, %c0_124] : memref<8x2x32xf32, #tpu.memory_space<vmem>>, vector<1x2x16xf32>
    %277 = vector.shape_cast %276 : vector<1x2x16xf32> to vector<2x16xf32>
    %278 = vector.shape_cast %274 : vector<2x16xf32> to vector<1x2x16xf32>
    tpu.vector_store %arg3[%275, %c0_123, %c0_124], %278 {strides = array<i32>} : memref<8x2x32xf32, #tpu.memory_space<vmem>>, vector<1x2x16xf32>,
    %279 = vector.extract_strided_slice %271 {offsets = [2, 0], sizes = [2, 16], strides = [1, 1]} : vector<4x16xf32> to vector<2x16xf32>
    %280 = arith.index_cast %228 : i32 to index
    %c0_125 = arith.constant 0 : index
    %c16_126 = arith.constant 16 : index
    %281 = vector.load %arg3[%280, %c0_125, %c16_126] : memref<8x2x32xf32, #tpu.memory_space<vmem>>, vector<1x2x16xf32>
    %282 = vector.shape_cast %281 : vector<1x2x16xf32> to vector<2x16xf32>
    %283 = vector.shape_cast %279 : vector<2x16xf32> to vector<1x2x16xf32>
    tpu.vector_store %arg3[%280, %c0_125, %c16_126], %283 {strides = array<i32>} : memref<8x2x32xf32, #tpu.memory_space<vmem>>, vector<1x2x16xf32>,
    %c5_i32 = arith.constant 5 : i32
    %c7_i32_127 = arith.constant 7 : i32
    %284 = arith.subi %c7_i32_127, %c5_i32 : i32
    %285 = arith.index_cast %c5_i32 : i32 to index
    %c0_128 = arith.constant 0 : index
    %c0_129 = arith.constant 0 : index
    %286 = vector.load %arg0[%285, %c0_128, %c0_129] : memref<8x2x16xf32, #tpu.memory_space<vmem>>, vector<1x2x16xf32>
    %287 = vector.shape_cast %286 : vector<1x2x16xf32> to vector<2x16xf32>
    %288 = arith.index_cast %284 : i32 to index
    %c0_130 = arith.constant 0 : index
    %c0_131 = arith.constant 0 : index
    %289 = vector.load %arg0[%288, %c0_130, %c0_131] : memref<8x2x16xf32, #tpu.memory_space<vmem>>, vector<1x2x16xf32>
    %290 = vector.shape_cast %289 : vector<1x2x16xf32> to vector<2x16xf32>
    %291 = tpu.concatenate %287, %290 in 0 : vector<2x16xf32>, vector<2x16xf32> -> vector<4x16xf32>
    %c0_132 = arith.constant 0 : index
    %c0_133 = arith.constant 0 : index
    %292 = vector.load %arg4[%c0_132, %c0_133] : memref<4x16xf32, #tpu.memory_space<vmem>>, vector<4x16xf32>
    %293 = tpu.concatenate %291, %292 in 1 : vector<4x16xf32>, vector<4x16xf32> -> vector<4x32xf32>
    %c0_134 = arith.constant 0 : index
    %c0_135 = arith.constant 0 : index
    %294 = vector.load %arg1[%c0_134, %c0_135] : memref<32x128xf32, #tpu.memory_space<vmem>>, vector<32x128xf32>
    %cst_136 = arith.constant dense<0.000000e+00> : vector<4x128xf32>
    %295 = tpu.matmul %293, %294, %cst_136 {dimension_numbers = #tpu.dot_dimension_numbers<[1], [0], [0], [1], [0, 0, 1, 1], [], []>} : vector<4x32xf32>, vector<32x128xf32>, vector<4x128xf32> -> vector<4x128xf32>
    %c0_137 = arith.constant 0 : index
    %c0_138 = arith.constant 0 : index
    %296 = vector.load %arg2[%c0_137, %c0_138] : memref<1x128xf32, #tpu.memory_space<vmem>>, vector<1x128xf32>
    %297 = vector.broadcast %296 : vector<1x128xf32> to vector<4x128xf32>
    %298 = arith.addf %295, %297 : vector<4x128xf32>
    %299 = vector.extract_strided_slice %298 {offsets = [0, 0], sizes = [2, 64], strides = [1, 1]} : vector<4x128xf32> to vector<2x64xf32>
    %300 = vector.extract_strided_slice %298 {offsets = [2, 64], sizes = [2, 64], strides = [1, 1]} : vector<4x128xf32> to vector<2x64xf32>
    %301 = tpu.concatenate %299, %300 in 0 : vector<2x64xf32>, vector<2x64xf32> -> vector<4x64xf32>
    %302 = vector.extract_strided_slice %301 {offsets = [0, 0], sizes = [4, 16], strides = [1, 1]} : vector<4x64xf32> to vector<4x16xf32>
    %303 = arith.negf %302 : vector<4x16xf32>
    %304 = math.exp %303 : vector<4x16xf32>
    %cst_139 = arith.constant 1.000000e+00 : f32
    %305 = vector.broadcast %cst_139 : f32 to vector<4x16xf32>
    %306 = arith.addf %305, %304 : vector<4x16xf32>
    %307 = arith.divf %305, %306 : vector<4x16xf32>
    %308 = vector.extract_strided_slice %301 {offsets = [0, 16], sizes = [4, 16], strides = [1, 1]} : vector<4x64xf32> to vector<4x16xf32>
    %309 = arith.negf %308 : vector<4x16xf32>
    %310 = math.exp %309 : vector<4x16xf32>
    %cst_140 = arith.constant 1.000000e+00 : f32
    %311 = vector.broadcast %cst_140 : f32 to vector<4x16xf32>
    %312 = arith.addf %311, %310 : vector<4x16xf32>
    %313 = arith.divf %311, %312 : vector<4x16xf32>
    %314 = vector.extract_strided_slice %301 {offsets = [0, 32], sizes = [4, 16], strides = [1, 1]} : vector<4x64xf32> to vector<4x16xf32>
    %315 = math.tanh %314 : vector<4x16xf32>
    %316 = vector.extract_strided_slice %301 {offsets = [0, 48], sizes = [4, 16], strides = [1, 1]} : vector<4x64xf32> to vector<4x16xf32>
    %317 = arith.negf %316 : vector<4x16xf32>
    %318 = math.exp %317 : vector<4x16xf32>
    %cst_141 = arith.constant 1.000000e+00 : f32
    %319 = vector.broadcast %cst_141 : f32 to vector<4x16xf32>
    %320 = arith.addf %319, %318 : vector<4x16xf32>
    %321 = arith.divf %319, %320 : vector<4x16xf32>
    %c0_142 = arith.constant 0 : index
    %c0_143 = arith.constant 0 : index
    %322 = vector.load %arg5[%c0_142, %c0_143] : memref<4x16xf32, #tpu.memory_space<vmem>>, vector<4x16xf32>
    %323 = arith.mulf %313, %322 : vector<4x16xf32>
    %324 = arith.mulf %307, %315 : vector<4x16xf32>
    %325 = arith.addf %323, %324 : vector<4x16xf32>
    %326 = math.tanh %325 : vector<4x16xf32>
    %327 = arith.mulf %321, %326 : vector<4x16xf32>
    %c0_144 = arith.constant 0 : index
    %c0_145 = arith.constant 0 : index
    %328 = vector.load %arg4[%c0_144, %c0_145] : memref<4x16xf32, #tpu.memory_space<vmem>>, vector<4x16xf32>
    tpu.vector_store %arg4[%c0_144, %c0_145], %327 {strides = array<i32>} : memref<4x16xf32, #tpu.memory_space<vmem>>, vector<4x16xf32>,
    %c0_146 = arith.constant 0 : index
    %c0_147 = arith.constant 0 : index
    %329 = vector.load %arg5[%c0_146, %c0_147] : memref<4x16xf32, #tpu.memory_space<vmem>>, vector<4x16xf32>
    tpu.vector_store %arg5[%c0_146, %c0_147], %325 {strides = array<i32>} : memref<4x16xf32, #tpu.memory_space<vmem>>, vector<4x16xf32>,
    %330 = vector.extract_strided_slice %327 {offsets = [0, 0], sizes = [2, 16], strides = [1, 1]} : vector<4x16xf32> to vector<2x16xf32>
    %331 = arith.index_cast %c5_i32 : i32 to index
    %c0_148 = arith.constant 0 : index
    %c0_149 = arith.constant 0 : index
    %332 = vector.load %arg3[%331, %c0_148, %c0_149] : memref<8x2x32xf32, #tpu.memory_space<vmem>>, vector<1x2x16xf32>
    %333 = vector.shape_cast %332 : vector<1x2x16xf32> to vector<2x16xf32>
    %334 = vector.shape_cast %330 : vector<2x16xf32> to vector<1x2x16xf32>
    tpu.vector_store %arg3[%331, %c0_148, %c0_149], %334 {strides = array<i32>} : memref<8x2x32xf32, #tpu.memory_space<vmem>>, vector<1x2x16xf32>,
    %335 = vector.extract_strided_slice %327 {offsets = [2, 0], sizes = [2, 16], strides = [1, 1]} : vector<4x16xf32> to vector<2x16xf32>
    %336 = arith.index_cast %284 : i32 to index
    %c0_150 = arith.constant 0 : index
    %c16_151 = arith.constant 16 : index
    %337 = vector.load %arg3[%336, %c0_150, %c16_151] : memref<8x2x32xf32, #tpu.memory_space<vmem>>, vector<1x2x16xf32>
    %338 = vector.shape_cast %337 : vector<1x2x16xf32> to vector<2x16xf32>
    %339 = vector.shape_cast %335 : vector<2x16xf32> to vector<1x2x16xf32>
    tpu.vector_store %arg3[%336, %c0_150, %c16_151], %339 {strides = array<i32>} : memref<8x2x32xf32, #tpu.memory_space<vmem>>, vector<1x2x16xf32>,
    %c6_i32 = arith.constant 6 : i32
    %c7_i32_152 = arith.constant 7 : i32
    %340 = arith.subi %c7_i32_152, %c6_i32 : i32
    %341 = arith.index_cast %c6_i32 : i32 to index
    %c0_153 = arith.constant 0 : index
    %c0_154 = arith.constant 0 : index
    %342 = vector.load %arg0[%341, %c0_153, %c0_154] : memref<8x2x16xf32, #tpu.memory_space<vmem>>, vector<1x2x16xf32>
    %343 = vector.shape_cast %342 : vector<1x2x16xf32> to vector<2x16xf32>
    %344 = arith.index_cast %340 : i32 to index
    %c0_155 = arith.constant 0 : index
    %c0_156 = arith.constant 0 : index
    %345 = vector.load %arg0[%344, %c0_155, %c0_156] : memref<8x2x16xf32, #tpu.memory_space<vmem>>, vector<1x2x16xf32>
    %346 = vector.shape_cast %345 : vector<1x2x16xf32> to vector<2x16xf32>
    %347 = tpu.concatenate %343, %346 in 0 : vector<2x16xf32>, vector<2x16xf32> -> vector<4x16xf32>
    %c0_157 = arith.constant 0 : index
    %c0_158 = arith.constant 0 : index
    %348 = vector.load %arg4[%c0_157, %c0_158] : memref<4x16xf32, #tpu.memory_space<vmem>>, vector<4x16xf32>
    %349 = tpu.concatenate %347, %348 in 1 : vector<4x16xf32>, vector<4x16xf32> -> vector<4x32xf32>
    %c0_159 = arith.constant 0 : index
    %c0_160 = arith.constant 0 : index
    %350 = vector.load %arg1[%c0_159, %c0_160] : memref<32x128xf32, #tpu.memory_space<vmem>>, vector<32x128xf32>
    %cst_161 = arith.constant dense<0.000000e+00> : vector<4x128xf32>
    %351 = tpu.matmul %349, %350, %cst_161 {dimension_numbers = #tpu.dot_dimension_numbers<[1], [0], [0], [1], [0, 0, 1, 1], [], []>} : vector<4x32xf32>, vector<32x128xf32>, vector<4x128xf32> -> vector<4x128xf32>
    %c0_162 = arith.constant 0 : index
    %c0_163 = arith.constant 0 : index
    %352 = vector.load %arg2[%c0_162, %c0_163] : memref<1x128xf32, #tpu.memory_space<vmem>>, vector<1x128xf32>
    %353 = vector.broadcast %352 : vector<1x128xf32> to vector<4x128xf32>
    %354 = arith.addf %351, %353 : vector<4x128xf32>
    %355 = vector.extract_strided_slice %354 {offsets = [0, 0], sizes = [2, 64], strides = [1, 1]} : vector<4x128xf32> to vector<2x64xf32>
    %356 = vector.extract_strided_slice %354 {offsets = [2, 64], sizes = [2, 64], strides = [1, 1]} : vector<4x128xf32> to vector<2x64xf32>
    %357 = tpu.concatenate %355, %356 in 0 : vector<2x64xf32>, vector<2x64xf32> -> vector<4x64xf32>
    %358 = vector.extract_strided_slice %357 {offsets = [0, 0], sizes = [4, 16], strides = [1, 1]} : vector<4x64xf32> to vector<4x16xf32>
    %359 = arith.negf %358 : vector<4x16xf32>
    %360 = math.exp %359 : vector<4x16xf32>
    %cst_164 = arith.constant 1.000000e+00 : f32
    %361 = vector.broadcast %cst_164 : f32 to vector<4x16xf32>
    %362 = arith.addf %361, %360 : vector<4x16xf32>
    %363 = arith.divf %361, %362 : vector<4x16xf32>
    %364 = vector.extract_strided_slice %357 {offsets = [0, 16], sizes = [4, 16], strides = [1, 1]} : vector<4x64xf32> to vector<4x16xf32>
    %365 = arith.negf %364 : vector<4x16xf32>
    %366 = math.exp %365 : vector<4x16xf32>
    %cst_165 = arith.constant 1.000000e+00 : f32
    %367 = vector.broadcast %cst_165 : f32 to vector<4x16xf32>
    %368 = arith.addf %367, %366 : vector<4x16xf32>
    %369 = arith.divf %367, %368 : vector<4x16xf32>
    %370 = vector.extract_strided_slice %357 {offsets = [0, 32], sizes = [4, 16], strides = [1, 1]} : vector<4x64xf32> to vector<4x16xf32>
    %371 = math.tanh %370 : vector<4x16xf32>
    %372 = vector.extract_strided_slice %357 {offsets = [0, 48], sizes = [4, 16], strides = [1, 1]} : vector<4x64xf32> to vector<4x16xf32>
    %373 = arith.negf %372 : vector<4x16xf32>
    %374 = math.exp %373 : vector<4x16xf32>
    %cst_166 = arith.constant 1.000000e+00 : f32
    %375 = vector.broadcast %cst_166 : f32 to vector<4x16xf32>
    %376 = arith.addf %375, %374 : vector<4x16xf32>
    %377 = arith.divf %375, %376 : vector<4x16xf32>
    %c0_167 = arith.constant 0 : index
    %c0_168 = arith.constant 0 : index
    %378 = vector.load %arg5[%c0_167, %c0_168] : memref<4x16xf32, #tpu.memory_space<vmem>>, vector<4x16xf32>
    %379 = arith.mulf %369, %378 : vector<4x16xf32>
    %380 = arith.mulf %363, %371 : vector<4x16xf32>
    %381 = arith.addf %379, %380 : vector<4x16xf32>
    %382 = math.tanh %381 : vector<4x16xf32>
    %383 = arith.mulf %377, %382 : vector<4x16xf32>
    %c0_169 = arith.constant 0 : index
    %c0_170 = arith.constant 0 : index
    %384 = vector.load %arg4[%c0_169, %c0_170] : memref<4x16xf32, #tpu.memory_space<vmem>>, vector<4x16xf32>
    tpu.vector_store %arg4[%c0_169, %c0_170], %383 {strides = array<i32>} : memref<4x16xf32, #tpu.memory_space<vmem>>, vector<4x16xf32>,
    %c0_171 = arith.constant 0 : index
    %c0_172 = arith.constant 0 : index
    %385 = vector.load %arg5[%c0_171, %c0_172] : memref<4x16xf32, #tpu.memory_space<vmem>>, vector<4x16xf32>
    tpu.vector_store %arg5[%c0_171, %c0_172], %381 {strides = array<i32>} : memref<4x16xf32, #tpu.memory_space<vmem>>, vector<4x16xf32>,
    %386 = vector.extract_strided_slice %383 {offsets = [0, 0], sizes = [2, 16], strides = [1, 1]} : vector<4x16xf32> to vector<2x16xf32>
    %387 = arith.index_cast %c6_i32 : i32 to index
    %c0_173 = arith.constant 0 : index
    %c0_174 = arith.constant 0 : index
    %388 = vector.load %arg3[%387, %c0_173, %c0_174] : memref<8x2x32xf32, #tpu.memory_space<vmem>>, vector<1x2x16xf32>
    %389 = vector.shape_cast %388 : vector<1x2x16xf32> to vector<2x16xf32>
    %390 = vector.shape_cast %386 : vector<2x16xf32> to vector<1x2x16xf32>
    tpu.vector_store %arg3[%387, %c0_173, %c0_174], %390 {strides = array<i32>} : memref<8x2x32xf32, #tpu.memory_space<vmem>>, vector<1x2x16xf32>,
    %391 = vector.extract_strided_slice %383 {offsets = [2, 0], sizes = [2, 16], strides = [1, 1]} : vector<4x16xf32> to vector<2x16xf32>
    %392 = arith.index_cast %340 : i32 to index
    %c0_175 = arith.constant 0 : index
    %c16_176 = arith.constant 16 : index
    %393 = vector.load %arg3[%392, %c0_175, %c16_176] : memref<8x2x32xf32, #tpu.memory_space<vmem>>, vector<1x2x16xf32>
    %394 = vector.shape_cast %393 : vector<1x2x16xf32> to vector<2x16xf32>
    %395 = vector.shape_cast %391 : vector<2x16xf32> to vector<1x2x16xf32>
    tpu.vector_store %arg3[%392, %c0_175, %c16_176], %395 {strides = array<i32>} : memref<8x2x32xf32, #tpu.memory_space<vmem>>, vector<1x2x16xf32>,
    %c7_i32_177 = arith.constant 7 : i32
    %c7_i32_178 = arith.constant 7 : i32
    %396 = arith.subi %c7_i32_178, %c7_i32_177 : i32
    %397 = arith.index_cast %c7_i32_177 : i32 to index
    %c0_179 = arith.constant 0 : index
    %c0_180 = arith.constant 0 : index
    %398 = vector.load %arg0[%397, %c0_179, %c0_180] : memref<8x2x16xf32, #tpu.memory_space<vmem>>, vector<1x2x16xf32>
    %399 = vector.shape_cast %398 : vector<1x2x16xf32> to vector<2x16xf32>
    %400 = arith.index_cast %396 : i32 to index
    %c0_181 = arith.constant 0 : index
    %c0_182 = arith.constant 0 : index
    %401 = vector.load %arg0[%400, %c0_181, %c0_182] : memref<8x2x16xf32, #tpu.memory_space<vmem>>, vector<1x2x16xf32>
    %402 = vector.shape_cast %401 : vector<1x2x16xf32> to vector<2x16xf32>
    %403 = tpu.concatenate %399, %402 in 0 : vector<2x16xf32>, vector<2x16xf32> -> vector<4x16xf32>
    %c0_183 = arith.constant 0 : index
    %c0_184 = arith.constant 0 : index
    %404 = vector.load %arg4[%c0_183, %c0_184] : memref<4x16xf32, #tpu.memory_space<vmem>>, vector<4x16xf32>
    %405 = tpu.concatenate %403, %404 in 1 : vector<4x16xf32>, vector<4x16xf32> -> vector<4x32xf32>
    %c0_185 = arith.constant 0 : index
    %c0_186 = arith.constant 0 : index
    %406 = vector.load %arg1[%c0_185, %c0_186] : memref<32x128xf32, #tpu.memory_space<vmem>>, vector<32x128xf32>
    %cst_187 = arith.constant dense<0.000000e+00> : vector<4x128xf32>
    %407 = tpu.matmul %405, %406, %cst_187 {dimension_numbers = #tpu.dot_dimension_numbers<[1], [0], [0], [1], [0, 0, 1, 1], [], []>} : vector<4x32xf32>, vector<32x128xf32>, vector<4x128xf32> -> vector<4x128xf32>
    %c0_188 = arith.constant 0 : index
    %c0_189 = arith.constant 0 : index
    %408 = vector.load %arg2[%c0_188, %c0_189] : memref<1x128xf32, #tpu.memory_space<vmem>>, vector<1x128xf32>
    %409 = vector.broadcast %408 : vector<1x128xf32> to vector<4x128xf32>
    %410 = arith.addf %407, %409 : vector<4x128xf32>
    %411 = vector.extract_strided_slice %410 {offsets = [0, 0], sizes = [2, 64], strides = [1, 1]} : vector<4x128xf32> to vector<2x64xf32>
    %412 = vector.extract_strided_slice %410 {offsets = [2, 64], sizes = [2, 64], strides = [1, 1]} : vector<4x128xf32> to vector<2x64xf32>
    %413 = tpu.concatenate %411, %412 in 0 : vector<2x64xf32>, vector<2x64xf32> -> vector<4x64xf32>
    %414 = vector.extract_strided_slice %413 {offsets = [0, 0], sizes = [4, 16], strides = [1, 1]} : vector<4x64xf32> to vector<4x16xf32>
    %415 = arith.negf %414 : vector<4x16xf32>
    %416 = math.exp %415 : vector<4x16xf32>
    %cst_190 = arith.constant 1.000000e+00 : f32
    %417 = vector.broadcast %cst_190 : f32 to vector<4x16xf32>
    %418 = arith.addf %417, %416 : vector<4x16xf32>
    %419 = arith.divf %417, %418 : vector<4x16xf32>
    %420 = vector.extract_strided_slice %413 {offsets = [0, 16], sizes = [4, 16], strides = [1, 1]} : vector<4x64xf32> to vector<4x16xf32>
    %421 = arith.negf %420 : vector<4x16xf32>
    %422 = math.exp %421 : vector<4x16xf32>
    %cst_191 = arith.constant 1.000000e+00 : f32
    %423 = vector.broadcast %cst_191 : f32 to vector<4x16xf32>
    %424 = arith.addf %423, %422 : vector<4x16xf32>
    %425 = arith.divf %423, %424 : vector<4x16xf32>
    %426 = vector.extract_strided_slice %413 {offsets = [0, 32], sizes = [4, 16], strides = [1, 1]} : vector<4x64xf32> to vector<4x16xf32>
    %427 = math.tanh %426 : vector<4x16xf32>
    %428 = vector.extract_strided_slice %413 {offsets = [0, 48], sizes = [4, 16], strides = [1, 1]} : vector<4x64xf32> to vector<4x16xf32>
    %429 = arith.negf %428 : vector<4x16xf32>
    %430 = math.exp %429 : vector<4x16xf32>
    %cst_192 = arith.constant 1.000000e+00 : f32
    %431 = vector.broadcast %cst_192 : f32 to vector<4x16xf32>
    %432 = arith.addf %431, %430 : vector<4x16xf32>
    %433 = arith.divf %431, %432 : vector<4x16xf32>
    %c0_193 = arith.constant 0 : index
    %c0_194 = arith.constant 0 : index
    %434 = vector.load %arg5[%c0_193, %c0_194] : memref<4x16xf32, #tpu.memory_space<vmem>>, vector<4x16xf32>
    %435 = arith.mulf %425, %434 : vector<4x16xf32>
    %436 = arith.mulf %419, %427 : vector<4x16xf32>
    %437 = arith.addf %435, %436 : vector<4x16xf32>
    %438 = math.tanh %437 : vector<4x16xf32>
    %439 = arith.mulf %433, %438 : vector<4x16xf32>
    %c0_195 = arith.constant 0 : index
    %c0_196 = arith.constant 0 : index
    %440 = vector.load %arg4[%c0_195, %c0_196] : memref<4x16xf32, #tpu.memory_space<vmem>>, vector<4x16xf32>
    tpu.vector_store %arg4[%c0_195, %c0_196], %439 {strides = array<i32>} : memref<4x16xf32, #tpu.memory_space<vmem>>, vector<4x16xf32>,
    %c0_197 = arith.constant 0 : index
    %c0_198 = arith.constant 0 : index
    %441 = vector.load %arg5[%c0_197, %c0_198] : memref<4x16xf32, #tpu.memory_space<vmem>>, vector<4x16xf32>
    tpu.vector_store %arg5[%c0_197, %c0_198], %437 {strides = array<i32>} : memref<4x16xf32, #tpu.memory_space<vmem>>, vector<4x16xf32>,
    %442 = vector.extract_strided_slice %439 {offsets = [0, 0], sizes = [2, 16], strides = [1, 1]} : vector<4x16xf32> to vector<2x16xf32>
    %443 = arith.index_cast %c7_i32_177 : i32 to index
    %c0_199 = arith.constant 0 : index
    %c0_200 = arith.constant 0 : index
    %444 = vector.load %arg3[%443, %c0_199, %c0_200] : memref<8x2x32xf32, #tpu.memory_space<vmem>>, vector<1x2x16xf32>
    %445 = vector.shape_cast %444 : vector<1x2x16xf32> to vector<2x16xf32>
    %446 = vector.shape_cast %442 : vector<2x16xf32> to vector<1x2x16xf32>
    tpu.vector_store %arg3[%443, %c0_199, %c0_200], %446 {strides = array<i32>} : memref<8x2x32xf32, #tpu.memory_space<vmem>>, vector<1x2x16xf32>,
    %447 = vector.extract_strided_slice %439 {offsets = [2, 0], sizes = [2, 16], strides = [1, 1]} : vector<4x16xf32> to vector<2x16xf32>
    %448 = arith.index_cast %396 : i32 to index
    %c0_201 = arith.constant 0 : index
    %c16_202 = arith.constant 16 : index
    %449 = vector.load %arg3[%448, %c0_201, %c16_202] : memref<8x2x32xf32, #tpu.memory_space<vmem>>, vector<1x2x16xf32>
    %450 = vector.shape_cast %449 : vector<1x2x16xf32> to vector<2x16xf32>
    %451 = vector.shape_cast %447 : vector<2x16xf32> to vector<1x2x16xf32>
    tpu.vector_store %arg3[%448, %c0_201, %c16_202], %451 {strides = array<i32>} : memref<8x2x32xf32, #tpu.memory_space<vmem>>, vector<1x2x16xf32>,
    %c8_i32 = arith.constant 8 : i32
    return
  }
}

</mosaic_0001>

<bundles_post_ra>
// kernel: tpu_custom_call.1
= control target key start
LH: loop header
LB: loop body
LE: loop exit
PB: predicated region body
PF: predicated region fallthrough
CT: control target
= control target key end

     0   :  { %8 = vsyncpa [#allocation5], 0  ;;  %s1912_s0 = inlined_call_operand.hbm [shape: f32[8,2,16], index: 0, kind: input, shape index: {}]   ;;  %s1913_s1 = inlined_call_operand.hbm [shape: f32[32,128], index: 1, kind: input, shape index: {}]   ;;  %s1914_s2 = inlined_call_operand.vmem [shape: f32[1,128], index: 2, kind: input, shape index: {}]   ;;  %s1915_s3 = inlined_call_operand.hbm [shape: f32[8,2,32], index: 3, kind: output, shape index: {}]  }
   0x1   :  { %9 = vsyncpa [#allocation8], 0 }
   0x2   :  { %10 = vsyncpa [#allocation6], 0  ;;  %s1594_s12 = smov [#allocation4]   ;;  %s1522_s16 = scalar_lea.hbm %s1912_s0, 256 }
   0x3   :  { %s16_s13 = sshll.u32 %s1594_s12, 4  ;;  %p1523_p0 = scmp.ne.s32.totalorder %s1912_s0, %s1522_s16  ;;  %s17_s13 = int_to_ptr.vmem [resolvable:$true] %s16_s13 }
   0x4   :  { %p1526_p1 = scmp.lt.u32.totalorder %s1522_s16, %s1912_s0 }
   0x6   :  { %p1528_p2 = pnand %p1526_p1, %p1523_p0 }
   0x8   :  { %1531 = shalt.err (!%p1528_p2)
}
   0x9   :  { %s1532_s21 = scalar_lea.vmem %s17_s13, 256  ;;  %p1537_p4 = scmp.lt.s32.totalorder %s17_s13, %s17_s13 }
   0xa   :  { %p1533_p3 = scmp.ne.s32.totalorder %s17_s13, %s1532_s21  ;;  %p1538_p5 = scmp.lt.s32.totalorder %s1532_s21, %s1532_s21 }
   0xc   :  { %p1539_p6 = por %p1538_p5, %p1537_p4 }
   0xe   :  { %p1540_p7 = pnand %p1539_p6, %p1533_p3 }
  0x10   :  { %1543 = shalt.err (!%p1540_p7)
}
  0x11   :  { %s1595_s22 = smov 32   ;;  %s1596_s23 = smov 2  }
  0x12   :  { %22 = dma.hbm_to_vmem [thread:$0]  %s1912_s0, 256, %s17_s13, [#allocation5], %s1595_s22, %s1595_s22, %s1596_s23  }
  0x13   :  { %s1597_s26 = smov [#allocation7]   ;;  %s1544_s30 = scalar_lea.hbm %s1913_s1, 512 }
  0x14   :  { %s28_s27 = sshll.u32 %s1597_s26, 4  ;;  %p1545_p8 = scmp.ne.s32.totalorder %s1913_s1, %s1544_s30  ;;  %s29_s27 = int_to_ptr.vmem [resolvable:$true] %s28_s27 }
  0x15   :  { %p1548_p9 = scmp.lt.u32.totalorder %s1544_s30, %s1913_s1 }
  0x17   :  { %p1550_p10 = pnand %p1548_p9, %p1545_p8 }
  0x19   :  { %1553 = shalt.err (!%p1550_p10)
}
  0x1a   :  { %s1554_s8 = scalar_lea.vmem %s29_s27, 512  ;;  %p1559_p12 = scmp.lt.s32.totalorder %s29_s27, %s29_s27 }
  0x1b   :  { %p1555_p11 = scmp.ne.s32.totalorder %s29_s27, %s1554_s8  ;;  %p1560_p13 = scmp.lt.s32.totalorder %s1554_s8, %s1554_s8 }
  0x1d   :  { %p1561_p0 = por %p1560_p13, %p1559_p12 }
  0x1f   :  { %p1562_p1 = pnand %p1561_p0, %p1555_p11 }
  0x21   :  { %1565 = shalt.err (!%p1562_p1)
}
  0x22   :  { %s1598_s0 = smov 128   ;;  %s1599_s9 = smov 8  }
  0x23   :  { %34 = dma.hbm_to_vmem [thread:$0]  %s1913_s1, 512, %s29_s27, [#allocation8], %s1598_s0, %s1598_s0, %s1599_s9  }
  0x24   :  { %1588 = dma.done.wait [#allocation5], 256  }
  0x25   :  { %1589 = vsyncadd [#allocation5], 4294967040 }
  0x26   :  { %1590 = dma.done.wait [#allocation8], 512  }
  0x27   :  { %1591 = vsyncadd [#allocation8], 4294966784  ;;  %vm43_vm0 = vcmask 125952   ;;  %v1600_v0 = vmov 0.0   ;;  %v1601_v1 = vmov 0.0|0.0   ;;  %vm1602_vm1 = vmmov 0  }
  0x28   :  { %44 = vst.msk [vmem:[#allocation2] sm:$0xf] %vm43_vm0, %v1600_v0  ;;  %45 = vst.msk [vmem:[#allocation3] sm:$0xf] %vm43_vm0, %v1600_v0  ;;  %1395 = vmatprep.subr.bf16.mxu0 %v1601_v1  ;;  %1401 = vmatprep.subr.bf16.mxu1 %v1601_v1  ;;  %v61_v2 = vld [vmem:[#allocation7] sm:$0xff]  ;;  %v62_v3 = vld [vmem:[#allocation7 + $0x8] sm:$0xff] }
  0x29   :  { %1315 = vmatprep.mubr.msk.f32.mxu0 %vm1602_vm1, %v1600_v0  ;;  %1326 = vmatprep.mubr.msk.f32.mxu1 %vm1602_vm1, %v1600_v0  ;;  %v63_v4 = vld [vmem:[#allocation7 + $0x10] sm:$0xff]  ;;  %v1666_v6 = vpack.c.bf16 %v62_v3, %v61_v2  ;;  %v64_v7 = vld [vmem:[#allocation7 + $0x18] sm:$0xff]  ;;  %s1603_s1 = smov 16   ;;  %vm52_vm2 = vcmask 1041408   ;;  %vm59_vm3 = vcmask 130048   ;;  %vm72_vm4 = vcmask 261120  }
  0x2a   :  { %v1670_v8 = vpack.c.bf16 %v64_v7, %v63_v4  ;;  %v48_v9 = vld [vmem:[#allocation4 + $0xe] sm:$0x3]  ;;  %v46_v11 = vld [vmem:[#allocation4] sm:$0x3]  ;;  %v1691_v15 = vld [vmem:[%s1914_s2] ss:$0 sm:$0xff] }
  0x2b   :  { %1397 = vmatpush3.bf16.msra.mxu0 %v1666_v6  ;;  %1403 = vmatpush3.bf16.msra.mxu1 %v1666_v6  ;;  %v50_v10 = vrot.slane %v48_v9, 6  ;;  %s1604_s14 = smov 64   ;;  %s1605_s15 = smov 96   ;;  %vm190_vm5 = vcmask 123904   ;;  %v201_v38 = vld [vmem:[#allocation4 + $0xc] sm:$0x3] }
  0x2c   :  { %1398 = vmatprep.subr.bf16.mxu0 %v1601_v1  ;;  %1404 = vmatprep.subr.bf16.mxu1 %v1601_v1  ;;  %s1606_s2 = smov 80   ;;  %s1607_s16 = smov 112   ;;  %v203_v39 = vrot.slane %v201_v38, 6  ;;  %v199_v40 = vld [vmem:[#allocation4 + $0x2] sm:$0x3]  ;;  %vm196_vm6 = vcmask 257154  }
  0x2d   :  { %v53_v12 = vsel %vm52_vm2, %v46_v11, %v50_v10  ;;  %v348_v9 = vld [vmem:[#allocation4 + $0x4] sm:$0x3]  ;;  %v499_v38 = vld [vmem:[#allocation4 + $0x8] sm:$0x3]  ;;  %s1608_s17 = smov [#allocation9]  }
  0x2e   :  { %v205_v41 = vsel %vm52_vm2, %v199_v40, %v203_v39  ;;  %v501_v39 = vrot.slane %v499_v38, 6  ;;  %v497_v40 = vld [vmem:[#allocation4 + $0x6] sm:$0x3]  ;;  %s1230_s18 = sshll.u32 %s1608_s17, 4  ;;  %s1231_s18 = int_to_ptr.vmem [resolvable:$true] %s1230_s18 }
  0x2f   :  { %v54_v5 = vld [vmem:[#allocation2] sm:$0xf]  ;;  %1400 = vmatpush3.bf16.msra.mxu0 %v1670_v8  ;;  %1406 = vmatpush3.bf16.msra.mxu1 %v1670_v8  ;;  %v158_v22 = vld [vmem:[#allocation3] sm:$0xf]  ;;  %s1566_s19 = scalar_lea.vmem %s1231_s18, 256  ;;  %p1571_p3 = scmp.lt.s32.totalorder %s1231_s18, %s1231_s18 }
  0x30   :  { %56 = vrot.lane.b32.xlu0 %v54_v5, %s1603_s1  ;;  %1407 = vmatprep.subr.bf16.mxu0 %v1601_v1  ;;  %v350_v5 = vld [vmem:[#allocation4 + $0xa] sm:$0x3]  ;;  %p1567_p2 = scmp.ne.s32.totalorder %s1231_s18, %s1566_s19  ;;  %p1572_p4 = scmp.lt.s32.totalorder %s1566_s19, %s1566_s19 }
  0x31   :  { %1413 = vmatprep.subr.bf16.mxu1 %v1601_v1  ;;  %v352_v7 = vrot.slane %v350_v5, 6 }
  0x32   :  { %p1573_p5 = por %p1572_p4, %p1571_p3 }
  0x33   :  { %v354_v10 = vsel %vm52_vm2, %v348_v9, %v352_v7  ;;  %v646_v7 = vld [vmem:[#allocation4 + $0x6] sm:$0x3] }
  0x34   :  { %v648_v9 = vrot.slane %v646_v7, 6  ;;  %p1574_p6 = pnand %p1573_p5, %p1567_p2 }
  0xa2   :  { %v57_v13 = vpop.permute.xlu0 %56 }
  0xa3   :  { %v60_v14 = vsel %vm59_vm3, %v53_v12, %v57_v13 }
  0xa4   :  { %1316 = vmatmul.mubr.msk.f32.vlgmr.msra.gmra.mrb[0].mxu0 %vm72_vm4, %v60_v14 }
  0xa5   :  { %1409 = vmatpush3.bf16.msra.mxu0 %v1666_v6  ;;  %1337 = vmatprep.mubr.msk.f32.mxu0 %vm1602_vm1, %v1600_v0 }
  0xa6   :  { %1410 = vmatprep.subr.bf16.mxu0 %v1601_v1 }
  0xa9   :  { %1412 = vmatpush3.bf16.msra.mxu0 %v1670_v8 }
  0xaa   :  { %1419 = vmatprep.subr.bf16.mxu0 %v1601_v1 }
 0x177   :  { %v142_v16 = vpop.f32.mrb[0].mxu0 }
 0x178   :  { %v143_v17 = vadd.f32 %v1691_v15, %v142_v16  ;;  %v1317_v18 = vpop.f32.mrb[1].mxu0 }
 0x17a   :  { %147 = vrot.lane.b32.xlu0 %v143_v17, %s1604_s14 }
 0x1ec   :  { %v148_v19 = vpop.permute.xlu0 %147 }
 0x1ed   :  { %v150_v20 = vsel %vm52_vm2, %v143_v17, %v148_v19 }
 0x1ee   :  { %1458 = vtanh.f32 %v150_v20  ;;  %v1245_v23 = vmul.f32 -1.442695, %v150_v20 }
 0x1f0   :  { %1460 = vpow2.f32 %v1245_v23 }
 0x1f8   :  { %v1459_v21 = vpop.eup %1458 }
 0x1f9   :  { %165 = vrot.lane.b32.xlu1 %v1459_v21, %s1605_s15 }
 0x1fa   :  { %v1461_v24 = vpop.eup %1460 }
 0x1fb   :  { %v154_v25 = vadd.f32 1.0, %v1461_v24 }
 0x1fd   :  { %160 = vrot.lane.b32.xlu1 %v158_v22, %s1603_s1  ;;  %1462 = vrcp.f32 %v154_v25 }
 0x207   :  { %v1463_v26 = vpop.eup %1462 }
 0x26b   :  { %v166_v27 = vpop.permute.xlu1 %165 }
 0x26c   :  { %v168_v28 = vmul.f32 %v1463_v26, %v166_v27 }
 0x26e   :  { %170 = vrot.lane.b32.xlu0 %v168_v28, %s1603_s1 }
 0x26f   :  { %v161_v29 = vpop.permute.xlu1 %160 }
 0x270   :  { %v163_v30 = vmul.f32 %v1463_v26, %v161_v29 }
 0x2e0   :  { %v171_v31 = vpop.permute.xlu0 %170 }
 0x2e1   :  { %v173_v32 = vadd.f32 %v171_v31, %v163_v30 }
 0x2e3   :  { %1464 = vtanh.f32 %v173_v32 }
 0x2ed   :  { %v1465_v33 = vpop.eup %1464 }
 0x2ee   :  { %176 = vrot.lane.b32.xlu1 %v1465_v33, %s1595_s22 }
 0x360   :  { %v177_v34 = vpop.permute.xlu1 %176 }
 0x361   :  { %v1700_v35 = vmul.f32 %v1463_v26, %v177_v34 }
 0x363   :  { %181 = vrot.lane.b32.xlu0 %v1700_v35, %s1606_s2 }
 0x3d5   :  { %v182_v36 = vpop.permute.xlu0 %181 }
 0x3d6   :  { %184 = vst.msk [vmem:[#allocation2] sm:$0xf] %vm43_vm0, %v182_v36 }
 0x3d7   :  { %191 = vst.msk [vmem:[#allocation9] sm:$0x3] %vm190_vm5, %v182_v36 }
 0x3dd   :  { %v206_v37 = vld [vmem:[#allocation2] sm:$0xf] }
 0x3de   :  { %208 = vrot.lane.b32.xlu1 %v206_v37, %s1603_s1 }
 0x3e2   :  { %186 = vrot.lane.b32.xlu1 %v173_v32, %s1607_s16 }
 0x450   :  { %v209_v42 = vpop.permute.xlu1 %208 }
 0x451   :  { %v211_v43 = vsel %vm59_vm3, %v205_v41, %v209_v42  ;;  %v503_v41 = vsel %vm52_vm2, %v497_v40, %v501_v39  ;;  %v791_v40 = vld [vmem:[#allocation4 + $0x4] sm:$0x3] }
 0x452   :  { %1327 = vmatmul.mubr.msk.f32.vlgmr.msra.gmra.mrb[0].mxu1 %vm72_vm4, %v211_v43 }
 0x453   :  { %1415 = vmatpush3.bf16.msra.mxu1 %v1666_v6  ;;  %1348 = vmatprep.mubr.msk.f32.mxu1 %vm1602_vm1, %v1600_v0 }
 0x454   :  { %v187_v44 = vpop.permute.xlu1 %186  ;;  %1416 = vmatprep.subr.bf16.mxu1 %v1601_v1 }
 0x455   :  { %189 = vst.msk [vmem:[#allocation3] sm:$0xf] %vm43_vm0, %v187_v44 }
 0x457   :  { %1418 = vmatpush3.bf16.msra.mxu1 %v1670_v8 }
 0x458   :  { %1425 = vmatprep.subr.bf16.mxu1 %v1601_v1 }
 0x45c   :  { %v308_v45 = vld [vmem:[#allocation3] sm:$0xf] }
 0x45d   :  { %310 = vrot.lane.b32.xlu1 %v308_v45, %s1603_s1 }
 0x4cf   :  { %v311_v58 = vpop.permute.xlu1 %310 }
 0x525   :  { %v292_v46 = vpop.f32.mrb[0].mxu1 }
 0x526   :  { %v293_v47 = vadd.f32 %v1691_v15, %v292_v46  ;;  %v1328_v48 = vpop.f32.mrb[1].mxu1 }
 0x528   :  { %297 = vrot.lane.b32.xlu0 %v293_v47, %s1604_s14 }
 0x59a   :  { %v298_v49 = vpop.permute.xlu0 %297 }
 0x59b   :  { %v300_v50 = vsel %vm52_vm2, %v293_v47, %v298_v49 }
 0x59c   :  { %1466 = vtanh.f32 %v300_v50  ;;  %v1248_v52 = vmul.f32 -1.442695, %v300_v50 }
 0x59e   :  { %1468 = vpow2.f32 %v1248_v52 }
 0x5a6   :  { %v1467_v51 = vpop.eup %1466 }
 0x5a7   :  { %315 = vrot.lane.b32.xlu0 %v1467_v51, %s1605_s15 }
 0x5a8   :  { %v1469_v53 = vpop.eup %1468 }
 0x5a9   :  { %v304_v54 = vadd.f32 1.0, %v1469_v53 }
 0x5ab   :  { %1470 = vrcp.f32 %v304_v54 }
 0x5b5   :  { %v1471_v55 = vpop.eup %1470 }
 0x5b6   :  { %v313_v59 = vmul.f32 %v1471_v55, %v311_v58 }
 0x619   :  { %v316_v56 = vpop.permute.xlu0 %315 }
 0x61a   :  { %v318_v57 = vmul.f32 %v1471_v55, %v316_v56 }
 0x61c   :  { %320 = vrot.lane.b32.xlu0 %v318_v57, %s1603_s1 }
 0x68e   :  { %v321_v60 = vpop.permute.xlu0 %320 }
 0x68f   :  { %v323_v61 = vadd.f32 %v321_v60, %v313_v59 }
 0x691   :  { %1472 = vtanh.f32 %v323_v61 }
 0x69b   :  { %v1473_v62 = vpop.eup %1472 }
 0x69c   :  { %326 = vrot.lane.b32.xlu1 %v1473_v62, %s1595_s22 }
 0x70e   :  { %v327_v63 = vpop.permute.xlu1 %326 }
 0x70f   :  { %v1725_v2 = vmul.f32 %v1471_v55, %v327_v63 }
 0x711   :  { %331 = vrot.lane.b32.xlu0 %v1725_v2, %s1606_s2 }
 0x783   :  { %v332_v3 = vpop.permute.xlu0 %331 }
 0x784   :  { %334 = vst.msk [vmem:[#allocation2] sm:$0xf] %vm43_vm0, %v332_v3 }
 0x785   :  { %341 = vst.msk [vmem:[#allocation9 + $0x2] sm:$0x3] %vm190_vm5, %v332_v3 }
 0x78b   :  { %v355_v4 = vld [vmem:[#allocation2] sm:$0xf] }
 0x78c   :  { %357 = vrot.lane.b32.xlu1 %v355_v4, %s1603_s1 }
 0x790   :  { %336 = vrot.lane.b32.xlu1 %v323_v61, %s1607_s16 }
 0x7fe   :  { %v358_v11 = vpop.permute.xlu1 %357 }
 0x7ff   :  { %v360_v12 = vsel %vm59_vm3, %v354_v10, %v358_v11  ;;  %v645_v10 = vld [vmem:[#allocation4 + $0x8] sm:$0x3] }
 0x800   :  { %1338 = vmatmul.mubr.msk.f32.vlgmr.msra.gmra.mrb[2].mxu0 %vm72_vm4, %v360_v12  ;;  %v650_v11 = vsel %vm52_vm2, %v645_v10, %v648_v9  ;;  %v935_v9 = vld [vmem:[#allocation4 + $0xc] sm:$0x3] }
 0x801   :  { %1421 = vmatpush3.bf16.msra.mxu0 %v1666_v6  ;;  %1359 = vmatprep.mubr.msk.f32.mxu0 %vm1602_vm1, %v1600_v0 }
 0x802   :  { %v337_v13 = vpop.permute.xlu1 %336  ;;  %1422 = vmatprep.subr.bf16.mxu0 %v1601_v1 }
 0x803   :  { %339 = vst.msk [vmem:[#allocation3] sm:$0xf] %vm43_vm0, %v337_v13 }
 0x805   :  { %1424 = vmatpush3.bf16.msra.mxu0 %v1670_v8 }
 0x806   :  { %1431 = vmatprep.subr.bf16.mxu0 %v1601_v1 }
 0x80a   :  { %v457_v14 = vld [vmem:[#allocation3] sm:$0xf] }
 0x80b   :  { %459 = vrot.lane.b32.xlu1 %v457_v14, %s1603_s1 }
 0x87d   :  { %v460_v28 = vpop.permute.xlu1 %459 }
 0x8d3   :  { %v441_v16 = vpop.f32.mrb[2].mxu0 }
 0x8d4   :  { %v442_v17 = vadd.f32 %v1691_v15, %v441_v16  ;;  %v1339_v18 = vpop.f32.mrb[3].mxu0 }
 0x8d6   :  { %446 = vrot.lane.b32.xlu0 %v442_v17, %s1604_s14 }
 0x948   :  { %v447_v19 = vpop.permute.xlu0 %446 }
 0x949   :  { %v449_v20 = vsel %vm52_vm2, %v442_v17, %v447_v19 }
 0x94a   :  { %1474 = vtanh.f32 %v449_v20  ;;  %v1251_v22 = vmul.f32 -1.442695, %v449_v20 }
 0x94c   :  { %1476 = vpow2.f32 %v1251_v22 }
 0x954   :  { %v1475_v21 = vpop.eup %1474 }
 0x955   :  { %464 = vrot.lane.b32.xlu0 %v1475_v21, %s1605_s15 }
 0x956   :  { %v1477_v23 = vpop.eup %1476 }
 0x957   :  { %v453_v24 = vadd.f32 1.0, %v1477_v23 }
 0x959   :  { %1478 = vrcp.f32 %v453_v24 }
 0x963   :  { %v1479_v25 = vpop.eup %1478 }
 0x964   :  { %v462_v29 = vmul.f32 %v1479_v25, %v460_v28 }
 0x9c7   :  { %v465_v26 = vpop.permute.xlu0 %464 }
 0x9c8   :  { %v467_v27 = vmul.f32 %v1479_v25, %v465_v26 }
 0x9ca   :  { %469 = vrot.lane.b32.xlu0 %v467_v27, %s1603_s1 }
 0xa3c   :  { %v470_v30 = vpop.permute.xlu0 %469 }
 0xa3d   :  { %v472_v31 = vadd.f32 %v470_v30, %v462_v29 }
 0xa3f   :  { %1480 = vtanh.f32 %v472_v31 }
 0xa49   :  { %v1481_v32 = vpop.eup %1480 }
 0xa4a   :  { %475 = vrot.lane.b32.xlu1 %v1481_v32, %s1595_s22 }
 0xabc   :  { %v476_v33 = vpop.permute.xlu1 %475 }
 0xabd   :  { %v1750_v34 = vmul.f32 %v1479_v25, %v476_v33 }
 0xabf   :  { %480 = vrot.lane.b32.xlu0 %v1750_v34, %s1606_s2 }
 0xb31   :  { %v481_v36 = vpop.permute.xlu0 %480 }
 0xb32   :  { %483 = vst.msk [vmem:[#allocation2] sm:$0xf] %vm43_vm0, %v481_v36 }
 0xb33   :  { %490 = vst.msk [vmem:[#allocation9 + $0x4] sm:$0x3] %vm190_vm5, %v481_v36 }
 0xb39   :  { %v504_v37 = vld [vmem:[#allocation2] sm:$0xf] }
 0xb3a   :  { %506 = vrot.lane.b32.xlu1 %v504_v37, %s1603_s1 }
 0xb3e   :  { %485 = vrot.lane.b32.xlu1 %v472_v31, %s1607_s16 }
 0xbac   :  { %v507_v42 = vpop.permute.xlu1 %506 }
 0xbad   :  { %v509_v43 = vsel %vm59_vm3, %v503_v41, %v507_v42  ;;  %v793_v41 = vrot.slane %v791_v40, 6  ;;  %v790_v42 = vld [vmem:[#allocation4 + $0xa] sm:$0x3] }
 0xbae   :  { %1349 = vmatmul.mubr.msk.f32.vlgmr.msra.gmra.mrb[2].mxu1 %vm72_vm4, %v509_v43 }
 0xbaf   :  { %1427 = vmatpush3.bf16.msra.mxu1 %v1666_v6  ;;  %1370 = vmatprep.mubr.msk.f32.mxu1 %vm1602_vm1, %v1600_v0  ;;  %v795_v43 = vsel %vm52_vm2, %v790_v42, %v793_v41  ;;  %v1081_v41 = vld [vmem:[#allocation4] sm:$0x3] }
 0xbb0   :  { %v486_v44 = vpop.permute.xlu1 %485  ;;  %1428 = vmatprep.subr.bf16.mxu1 %v1601_v1  ;;  %v1083_v42 = vrot.slane %v1081_v41, 6 }
 0xbb1   :  { %488 = vst.msk [vmem:[#allocation3] sm:$0xf] %vm43_vm0, %v486_v44 }
 0xbb3   :  { %1430 = vmatpush3.bf16.msra.mxu1 %v1670_v8 }
 0xbb4   :  { %1437 = vmatprep.subr.bf16.mxu1 %v1601_v1 }
 0xbb8   :  { %v606_v45 = vld [vmem:[#allocation3] sm:$0xf] }
 0xbb9   :  { %608 = vrot.lane.b32.xlu1 %v606_v45, %s1603_s1 }
 0xc2b   :  { %v609_v58 = vpop.permute.xlu1 %608 }
 0xc81   :  { %v590_v46 = vpop.f32.mrb[2].mxu1 }
 0xc82   :  { %v591_v47 = vadd.f32 %v1691_v15, %v590_v46  ;;  %v1350_v48 = vpop.f32.mrb[3].mxu1 }
 0xc84   :  { %595 = vrot.lane.b32.xlu0 %v591_v47, %s1604_s14 }
 0xcf6   :  { %v596_v49 = vpop.permute.xlu0 %595 }
 0xcf7   :  { %v598_v50 = vsel %vm52_vm2, %v591_v47, %v596_v49 }
 0xcf8   :  { %1482 = vtanh.f32 %v598_v50  ;;  %v1254_v52 = vmul.f32 -1.442695, %v598_v50 }
 0xcfa   :  { %1484 = vpow2.f32 %v1254_v52 }
 0xd02   :  { %v1483_v51 = vpop.eup %1482 }
 0xd03   :  { %613 = vrot.lane.b32.xlu0 %v1483_v51, %s1605_s15 }
 0xd04   :  { %v1485_v53 = vpop.eup %1484 }
 0xd05   :  { %v602_v54 = vadd.f32 1.0, %v1485_v53 }
 0xd07   :  { %1486 = vrcp.f32 %v602_v54 }
 0xd11   :  { %v1487_v55 = vpop.eup %1486 }
 0xd12   :  { %v611_v59 = vmul.f32 %v1487_v55, %v609_v58 }
 0xd75   :  { %v614_v56 = vpop.permute.xlu0 %613 }
 0xd76   :  { %v616_v57 = vmul.f32 %v1487_v55, %v614_v56 }
 0xd78   :  { %618 = vrot.lane.b32.xlu0 %v616_v57, %s1603_s1 }
 0xdea   :  { %v619_v60 = vpop.permute.xlu0 %618 }
 0xdeb   :  { %v621_v61 = vadd.f32 %v619_v60, %v611_v59 }
 0xded   :  { %1488 = vtanh.f32 %v621_v61 }
 0xdf7   :  { %v1489_v62 = vpop.eup %1488 }
 0xdf8   :  { %624 = vrot.lane.b32.xlu1 %v1489_v62, %s1595_s22 }
 0xe6a   :  { %v625_v63 = vpop.permute.xlu1 %624 }
 0xe6b   :  { %v1775_v3 = vmul.f32 %v1487_v55, %v625_v63 }
 0xe6d   :  { %629 = vrot.lane.b32.xlu0 %v1775_v3, %s1606_s2 }
 0xedf   :  { %v630_v4 = vpop.permute.xlu0 %629 }
 0xee0   :  { %632 = vst.msk [vmem:[#allocation2] sm:$0xf] %vm43_vm0, %v630_v4 }
 0xee1   :  { %639 = vst.msk [vmem:[#allocation9 + $0x6] sm:$0x3] %vm190_vm5, %v630_v4 }
 0xee7   :  { %v651_v5 = vld [vmem:[#allocation2] sm:$0xf] }
 0xee8   :  { %653 = vrot.lane.b32.xlu1 %v651_v5, %s1603_s1  ;;  %v936_v5 = vld [vmem:[#allocation4 + $0x2] sm:$0x3] }
 0xee9   :  { %v938_v7 = vrot.slane %v936_v5, 6 }
 0xeeb   :  { %v940_v10 = vsel %vm52_vm2, %v935_v9, %v938_v7 }
 0xeec   :  { %634 = vrot.lane.b32.xlu1 %v621_v61, %s1607_s16 }
 0xf5a   :  { %v654_v12 = vpop.permute.xlu1 %653 }
 0xf5b   :  { %v656_v13 = vsel %vm59_vm3, %v650_v11, %v654_v12 }
 0xf5c   :  { %1360 = vmatmul.mubr.msk.f32.vlgmr.msra.gmra.mrb[4].mxu0 %vm72_vm4, %v656_v13 }
 0xf5d   :  { %1433 = vmatpush3.bf16.msra.mxu0 %v1666_v6  ;;  %1381 = vmatprep.mubr.msk.f32.mxu0 %vm1602_vm1, %v1600_v0 }
 0xf5e   :  { %v635_v14 = vpop.permute.xlu1 %634  ;;  %1434 = vmatprep.subr.bf16.mxu0 %v1601_v1 }
 0xf5f   :  { %637 = vst.msk [vmem:[#allocation3] sm:$0xf] %vm43_vm0, %v635_v14 }
 0xf61   :  { %1436 = vmatpush3.bf16.msra.mxu0 %v1670_v8 }
 0xf66   :  { %v753_v16 = vld [vmem:[#allocation3] sm:$0xf] }
 0xf67   :  { %755 = vrot.lane.b32.xlu1 %v753_v16, %s1603_s1 }
 0xfd9   :  { %v756_v29 = vpop.permute.xlu1 %755 }
0x102f   :  { %v737_v17 = vpop.f32.mrb[4].mxu0 }
0x1030   :  { %v738_v18 = vadd.f32 %v1691_v15, %v737_v17  ;;  %v1361_v19 = vpop.f32.mrb[5].mxu0 }
0x1032   :  { %742 = vrot.lane.b32.xlu0 %v738_v18, %s1604_s14 }
0x10a4   :  { %v743_v20 = vpop.permute.xlu0 %742 }
0x10a5   :  { %v745_v21 = vsel %vm52_vm2, %v738_v18, %v743_v20 }
0x10a6   :  { %1490 = vtanh.f32 %v745_v21  ;;  %v1257_v23 = vmul.f32 -1.442695, %v745_v21 }
0x10a8   :  { %1492 = vpow2.f32 %v1257_v23 }
0x10b0   :  { %v1491_v22 = vpop.eup %1490 }
0x10b1   :  { %760 = vrot.lane.b32.xlu0 %v1491_v22, %s1605_s15 }
0x10b2   :  { %v1493_v24 = vpop.eup %1492 }
0x10b3   :  { %v749_v25 = vadd.f32 1.0, %v1493_v24 }
0x10b5   :  { %1494 = vrcp.f32 %v749_v25 }
0x10bf   :  { %v1495_v26 = vpop.eup %1494 }
0x10c0   :  { %v758_v30 = vmul.f32 %v1495_v26, %v756_v29 }
0x1123   :  { %v761_v27 = vpop.permute.xlu0 %760 }
0x1124   :  { %v763_v28 = vmul.f32 %v1495_v26, %v761_v27 }
0x1126   :  { %765 = vrot.lane.b32.xlu0 %v763_v28, %s1603_s1 }
0x1198   :  { %v766_v31 = vpop.permute.xlu0 %765 }
0x1199   :  { %v768_v32 = vadd.f32 %v766_v31, %v758_v30 }
0x119b   :  { %1496 = vtanh.f32 %v768_v32 }
0x11a5   :  { %v1497_v33 = vpop.eup %1496 }
0x11a6   :  { %771 = vrot.lane.b32.xlu1 %v1497_v33, %s1595_s22 }
0x1218   :  { %v772_v36 = vpop.permute.xlu1 %771 }
0x1219   :  { %v1799_v37 = vmul.f32 %v1495_v26, %v772_v36 }
0x121b   :  { %776 = vrot.lane.b32.xlu0 %v1799_v37, %s1606_s2 }
0x128d   :  { %v1803_v38 = vpop.permute.xlu0 %776 }
0x128e   :  { %779 = vst.msk [vmem:[#allocation2] sm:$0xf] %vm43_vm0, %v1803_v38 }
0x1295   :  { %v796_v39 = vld [vmem:[#allocation2] sm:$0xf] }
0x1296   :  { %798 = vrot.lane.b32.xlu1 %v796_v39, %s1603_s1 }
0x129a   :  { %781 = vrot.lane.b32.xlu1 %v768_v32, %s1607_s16 }
0x1308   :  { %v799_v44 = vpop.permute.xlu1 %798 }
0x1309   :  { %v801_v45 = vsel %vm59_vm3, %v795_v43, %v799_v44  ;;  %v1080_v43 = vld [vmem:[#allocation4 + $0xe] sm:$0x3] }
0x130a   :  { %1371 = vmatmul.mubr.msk.f32.vlgmr.msra.gmra.mrb[4].mxu1 %vm72_vm4, %v801_v45  ;;  %v1085_v44 = vsel %vm52_vm2, %v1080_v43, %v1083_v42 }
0x130b   :  { %1439 = vmatpush3.bf16.msra.mxu1 %v1666_v6  ;;  %1392 = vmatprep.mubr.msk.f32.mxu1 %vm1602_vm1, %v1600_v0 }
0x130c   :  { %v782_v46 = vpop.permute.xlu1 %781  ;;  %1440 = vmatprep.subr.bf16.mxu1 %v1601_v1 }
0x130d   :  { %784 = vst.msk [vmem:[#allocation3] sm:$0xf] %vm43_vm0, %v782_v46 }
0x130f   :  { %1442 = vmatpush3.bf16.msra.mxu1 %v1670_v8 }
0x1314   :  { %v898_v47 = vld [vmem:[#allocation3] sm:$0xf] }
0x1315   :  { %900 = vrot.lane.b32.xlu1 %v898_v47, %s1603_s1 }
0x1387   :  { %v901_v56 = vpop.permute.xlu1 %900 }
0x13dd   :  { %v882_v48 = vpop.f32.mrb[4].mxu1 }
0x13de   :  { %v883_v49 = vadd.f32 %v1691_v15, %v882_v48  ;;  %v1372_v50 = vpop.f32.mrb[5].mxu1 }
0x13e0   :  { %887 = vrot.lane.b32.xlu0 %v883_v49, %s1604_s14 }
0x1452   :  { %v888_v6 = vpop.permute.xlu0 %887 }
0x1453   :  { %v890_v51 = vsel %vm52_vm2, %v883_v49, %v888_v6 }
0x1454   :  { %1498 = vtanh.f32 %v890_v51  ;;  %v1260_v1 = vmul.f32 -1.442695, %v890_v51 }
0x1456   :  { %1500 = vpow2.f32 %v1260_v1 }
0x145e   :  { %v1499_v0 = vpop.eup %1498 }
0x145f   :  { %905 = vrot.lane.b32.xlu0 %v1499_v0, %s1605_s15 }
0x1460   :  { %v1501_v52 = vpop.eup %1500 }
0x1461   :  { %v894_v8 = vadd.f32 1.0, %v1501_v52 }
0x1463   :  { %1502 = vrcp.f32 %v894_v8 }
0x146d   :  { %v1503_v53 = vpop.eup %1502 }
0x146e   :  { %v903_v57 = vmul.f32 %v1503_v53, %v901_v56 }
0x14d1   :  { %v906_v54 = vpop.permute.xlu0 %905 }
0x14d2   :  { %v908_v55 = vmul.f32 %v1503_v53, %v906_v54 }
0x14d4   :  { %910 = vrot.lane.b32.xlu0 %v908_v55, %s1603_s1 }
0x1546   :  { %v911_v58 = vpop.permute.xlu0 %910 }
0x1547   :  { %v913_v59 = vadd.f32 %v911_v58, %v903_v57 }
0x1549   :  { %1504 = vtanh.f32 %v913_v59 }
0x1553   :  { %v1505_v60 = vpop.eup %1504 }
0x1554   :  { %916 = vrot.lane.b32.xlu1 %v1505_v60, %s1595_s22 }
0x15c6   :  { %v917_v61 = vpop.permute.xlu1 %916 }
0x15c7   :  { %v1825_v62 = vmul.f32 %v1503_v53, %v917_v61 }
0x15c9   :  { %921 = vrot.lane.b32.xlu0 %v1825_v62, %s1606_s2 }
0x163b   :  { %v1829_v63 = vpop.permute.xlu0 %921 }
0x163c   :  { %924 = vst.msk [vmem:[#allocation2] sm:$0xf] %vm43_vm0, %v1829_v63 }
0x1643   :  { %v941_v4 = vld [vmem:[#allocation2] sm:$0xf] }
0x1644   :  { %943 = vrot.lane.b32.xlu1 %v941_v4, %s1603_s1 }
0x1648   :  { %926 = vrot.lane.b32.xlu1 %v913_v59, %s1607_s16 }
0x16b6   :  { %v944_v11 = vpop.permute.xlu1 %943 }
0x16b7   :  { %v946_v12 = vsel %vm59_vm3, %v940_v10, %v944_v11 }
0x16b8   :  { %1382 = vmatmul.mubr.msk.f32.vlgmr.msra.gmra.mrb[6].mxu0 %vm72_vm4, %v946_v12 }
0x16ba   :  { %v927_v13 = vpop.permute.xlu1 %926 }
0x16bb   :  { %929 = vst.msk [vmem:[#allocation3] sm:$0xf] %vm43_vm0, %v927_v13 }
0x16c2   :  { %v1043_v14 = vld [vmem:[#allocation3] sm:$0xf] }
0x16c3   :  { %1045 = vrot.lane.b32.xlu1 %v1043_v14, %s1603_s1 }
0x1735   :  { %v1046_v28 = vpop.permute.xlu1 %1045 }
0x178b   :  { %v1027_v16 = vpop.f32.mrb[6].mxu0 }
0x178c   :  { %v1028_v17 = vadd.f32 %v1691_v15, %v1027_v16  ;;  %v1383_v18 = vpop.f32.mrb[7].mxu0 }
0x178e   :  { %1032 = vrot.lane.b32.xlu0 %v1028_v17, %s1604_s14 }
0x1800   :  { %v1033_v19 = vpop.permute.xlu0 %1032 }
0x1801   :  { %v1035_v20 = vsel %vm52_vm2, %v1028_v17, %v1033_v19 }
0x1802   :  { %1506 = vtanh.f32 %v1035_v20  ;;  %v1263_v22 = vmul.f32 -1.442695, %v1035_v20 }
0x1804   :  { %1508 = vpow2.f32 %v1263_v22 }
0x180c   :  { %v1507_v21 = vpop.eup %1506 }
0x180d   :  { %1050 = vrot.lane.b32.xlu0 %v1507_v21, %s1605_s15 }
0x180e   :  { %v1509_v23 = vpop.eup %1508 }
0x180f   :  { %v1039_v24 = vadd.f32 1.0, %v1509_v23 }
0x1811   :  { %1510 = vrcp.f32 %v1039_v24 }
0x181b   :  { %v1511_v25 = vpop.eup %1510 }
0x181c   :  { %v1048_v29 = vmul.f32 %v1511_v25, %v1046_v28 }
0x187f   :  { %v1051_v26 = vpop.permute.xlu0 %1050 }
0x1880   :  { %v1053_v27 = vmul.f32 %v1511_v25, %v1051_v26 }
0x1882   :  { %1055 = vrot.lane.b32.xlu0 %v1053_v27, %s1603_s1 }
0x18f4   :  { %v1056_v30 = vpop.permute.xlu0 %1055 }
0x18f5   :  { %v1058_v31 = vadd.f32 %v1056_v30, %v1048_v29 }
0x18f7   :  { %1512 = vtanh.f32 %v1058_v31 }
0x1901   :  { %v1513_v32 = vpop.eup %1512 }
0x1902   :  { %1061 = vrot.lane.b32.xlu1 %v1513_v32, %s1595_s22 }
0x1974   :  { %v1062_v33 = vpop.permute.xlu1 %1061 }
0x1975   :  { %v1064_v36 = vmul.f32 %v1511_v25, %v1062_v33 }
0x1977   :  { %1066 = vrot.lane.b32.xlu0 %v1064_v36, %s1606_s2 }
0x19e9   :  { %v1847_v39 = vpop.permute.xlu0 %1066 }
0x19ea   :  { %1069 = vst.msk [vmem:[#allocation2] sm:$0xf] %vm43_vm0, %v1847_v39 }
0x19f1   :  { %v1086_v40 = vld [vmem:[#allocation2] sm:$0xf] }
0x19f2   :  { %1088 = vrot.lane.b32.xlu1 %v1086_v40, %s1603_s1 }
0x19f6   :  { %1071 = vrot.lane.b32.xlu1 %v1058_v31, %s1607_s16 }
0x1a64   :  { %v1089_v45 = vpop.permute.xlu1 %1088 }
0x1a65   :  { %v1091_v46 = vsel %vm59_vm3, %v1085_v44, %v1089_v45 }
0x1a66   :  { %1393 = vmatmul.mubr.msk.f32.vlgmr.msra.gmra.mrb[6].mxu1 %vm72_vm4, %v1091_v46 }
0x1a68   :  { %v1072_v47 = vpop.permute.xlu1 %1071 }
0x1a69   :  { %1074 = vst.msk [vmem:[#allocation3] sm:$0xf] %vm43_vm0, %v1072_v47 }
0x1a70   :  { %v1188_v48 = vld [vmem:[#allocation3] sm:$0xf] }
0x1a71   :  { %1190 = vrot.lane.b32.xlu1 %v1188_v48, %s1603_s1 }
0x1b39   :  { %v1172_v49 = vpop.f32.mrb[6].mxu1 }
0x1b3a   :  { %v1173_v50 = vadd.f32 %v1691_v15, %v1172_v49  ;;  %v1394_v6 = vpop.f32.mrb[7].mxu1  ;;  %v1191_v15 = vpop.permute.xlu1 %1190 }
0x1b3c   :  { %1177 = vrot.lane.b32.xlu0 %v1173_v50, %s1604_s14 }
0x1bae   :  { %v1178_v51 = vpop.permute.xlu0 %1177 }
0x1baf   :  { %v1180_v0 = vsel %vm52_vm2, %v1173_v50, %v1178_v51 }
0x1bb0   :  { %1514 = vtanh.f32 %v1180_v0  ;;  %v1266_v52 = vmul.f32 -1.442695, %v1180_v0 }
0x1bb2   :  { %1516 = vpow2.f32 %v1266_v52 }
0x1bba   :  { %v1515_v1 = vpop.eup %1514 }
0x1bbb   :  { %1195 = vrot.lane.b32.xlu0 %v1515_v1, %s1605_s15 }
0x1bbc   :  { %v1517_v8 = vpop.eup %1516 }
0x1bbd   :  { %v1184_v53 = vadd.f32 1.0, %v1517_v8 }
0x1bbf   :  { %1518 = vrcp.f32 %v1184_v53 }
0x1bc9   :  { %v1519_v54 = vpop.eup %1518 }
0x1bca   :  { %v1193_v57 = vmul.f32 %v1519_v54, %v1191_v15 }
0x1c2d   :  { %v1196_v55 = vpop.permute.xlu0 %1195 }
0x1c2e   :  { %v1198_v56 = vmul.f32 %v1519_v54, %v1196_v55 }
0x1c30   :  { %1200 = vrot.lane.b32.xlu0 %v1198_v56, %s1603_s1 }
0x1c34   :  { %192 = vrot.lane.b32.xlu0 %v1700_v35, %s1605_s15 }
0x1c38   :  { %491 = vrot.lane.b32.xlu0 %v1750_v34, %s1605_s15 }
0x1c3c   :  { %786 = vrot.lane.b32.xlu0 %v1799_v37, %s1605_s15 }
0x1c40   :  { %1076 = vrot.lane.b32.xlu0 %v1064_v36, %s1605_s15 }
0x1ca2   :  { %v1201_v58 = vpop.permute.xlu0 %1200 }
0x1ca3   :  { %v1203_v59 = vadd.f32 %v1201_v58, %v1193_v57 }
0x1ca5   :  { %1520 = vtanh.f32 %v1203_v59 }
0x1ca6   :  { %v193_v60 = vpop.permute.xlu0 %192 }
0x1ca7   :  { %197 = vst.msk [vmem:[#allocation9 + $0xc] sm:$0xc] %vm196_vm6, %v193_v60 }
0x1caa   :  { %v492_v61 = vpop.permute.xlu0 %491 }
0x1cab   :  { %495 = vst.msk [vmem:[#allocation9 + $0x8] sm:$0xc] %vm196_vm6, %v492_v61 }
0x1cac   :  { %930 = vst.msk [vmem:[#allocation9 + $0xa] sm:$0x3] %vm190_vm5, %v1829_v63 }
0x1cae   :  { %v787_v35 = vpop.permute.xlu0 %786 }
0x1caf   :  { %v1521_v34 = vpop.eup %1520  ;;  %789 = vst.msk [vmem:[#allocation9 + $0x4] sm:$0xc] %vm196_vm6, %v787_v35 }
0x1cb0   :  { %1206 = vrot.lane.b32.xlu1 %v1521_v34, %s1595_s22 }
0x1cb2   :  { %v1077_v37 = vpop.permute.xlu0 %1076 }
0x1cb3   :  { %1079 = vst.msk [vmem:[#allocation9] sm:$0xc] %vm196_vm6, %v1077_v37 }
0x1cb4   :  { %342 = vrot.lane.b32.xlu1 %v1725_v2, %s1605_s15 }
0x1cb8   :  { %640 = vrot.lane.b32.xlu1 %v1775_v3, %s1605_s15 }
0x1cbc   :  { %931 = vrot.lane.b32.xlu1 %v1825_v62, %s1605_s15 }
0x1d22   :  { %v1207_v4 = vpop.permute.xlu1 %1206 }
0x1d23   :  { %v1209_v63 = vmul.f32 %v1519_v54, %v1207_v4 }
0x1d25   :  { %1221 = vrot.lane.b32.xlu0 %v1209_v63, %s1605_s15  ;;  %1211 = vrot.lane.b32.xlu1 %v1209_v63, %s1606_s2 }
0x1d26   :  { %v343_v5 = vpop.permute.xlu1 %342 }
0x1d27   :  { %346 = vst.msk [vmem:[#allocation9 + $0xa] sm:$0xc] %vm196_vm6, %v343_v5 }
0x1d28   :  { %1075 = vst.msk [vmem:[#allocation9 + $0xc] sm:$0x3] %vm190_vm5, %v1847_v39 }
0x1d29   :  { %1216 = vrot.lane.b32.xlu1 %v1203_v59, %s1607_s16 }
0x1d2a   :  { %v641_v2 = vpop.permute.xlu1 %640 }
0x1d2b   :  { %644 = vst.msk [vmem:[#allocation9 + $0x6] sm:$0xc] %vm196_vm6, %v641_v2 }
0x1d2c   :  { %785 = vst.msk [vmem:[#allocation9 + $0x8] sm:$0x3] %vm190_vm5, %v1803_v38 }
0x1d2e   :  { %v932_v3 = vpop.permute.xlu1 %931 }
0x1d2f   :  { %934 = vst.msk [vmem:[#allocation9 + $0x2] sm:$0xc] %vm196_vm6, %v932_v3 }
0x1d97   :  { %v1222_v62 = vpop.permute.xlu0 %1221  ;;  %v1212_v7 = vpop.permute.xlu1 %1211 }
0x1d98   :  { %1224 = vst.msk [vmem:[#allocation9 - $0x2] sm:$0xc] %vm196_vm6, %v1222_v62 }
0x1d99   :  { %1214 = vst.msk [vmem:[#allocation2] sm:$0xf] %vm43_vm0, %v1212_v7 }
0x1d9a   :  { %1220 = vst.msk [vmem:[#allocation9 + $0xe] sm:$0x3] %vm190_vm5, %v1212_v7 }
0x1d9b   :  { %1577 = shalt.err (!%p1574_p6)
}
0x1d9c   :  { %s1578_s24 = scalar_lea.hbm %s1915_s3, 256 }
0x1d9d   :  { %p1579_p7 = scmp.ne.s32.totalorder %s1915_s3, %s1578_s24  ;;  %p1582_p8 = scmp.lt.u32.totalorder %s1578_s24, %s1915_s3 }
0x1d9f   :  { %p1584_p9 = pnand %p1582_p8, %p1579_p7 }
0x1da1   :  { %1587 = shalt.err (!%p1584_p9)
}
0x1da2   :  { %1236 = dma.vmem_to_hbm [thread:$0]  %s1231_s18, 256, %s1915_s3, [#allocation6], %s1595_s22, %s1595_s22, %s1596_s23   ;;  %v1217_v38 = vpop.permute.xlu1 %1216 }
0x1da3   :  { %1219 = vst.msk [vmem:[#allocation3] sm:$0xf] %vm43_vm0, %v1217_v38 }
0x1da4   :  { %1592 = dma.done.wait [#allocation6], 256  }
0x1da5   :  { %1593 = vsyncadd [#allocation6], 4294967040 }
0x1da6   :  { %1240 = vsyncpa [#allocation5], 1 }
0x1da7   :  { %1241 = vsyncpa [#allocation8], 1 }
0x1da8   :  { %1242 = vsyncpa [#allocation6], 1 }

</bundles_post_ra>
